<compile_context>
chip_gen: v7x
topology: tpu7x:2x2x1
jax: 0.10.0
libtpu: 0.0.40
codegen_flags: <defaults>
</compile_context>

<pallas_src>
import functools

import jax
import jax.numpy as jnp
from jax import lax
from jax.experimental import pallas as pl
from jax.experimental.pallas import tpu as pltpu

# Module hyper-parameters (defaults of FSMNUnit).
DIMLINEAR = 128   # input / output feature dim
DIMPROJ = 64      # fsmn projection dim
LORDER = 20       # left memory order
RORDER = 1        # right memory order
LSTRIDE = 1
RSTRIDE = 1

# Small example shapes: (batch, time, channel, feature).
B, T, C = 2, 16, 3


def _fsmn_unit_kernel(x_ref, wshd_ref, wl_ref, wr_ref, wexd_ref, bexd_ref, o_ref,
                      *, t, lorder, rorder, lstride, rstride, matmul_dtype):
    """One block of 2 * g_blk (batch, channel) groups, all T frames.

    x_ref   : (2, g_blk, T, DL)   two lane-halves of groups (native group layout)
    wshd_ref: (2*DL, 2*DP)        block-diag shrink weight (transposed)
    wl_ref  : (LORDER, 2*DP)      left taps tiled to both lane-halves
                                  (identity already folded into wl[0])
    wr_ref  : (RORDER, 2*DP)      right taps tiled to both lane-halves
    wexd_ref: (2*DP, 2*DL)        block-diag expand weight (transposed)
    bexd_ref: (1, 2*DL)           expand bias tiled to both lane-halves (f32)
    o_ref   : (2, g_blk, T, DL)   output block
    """
    _, g_blk, _, dl = x_ref.shape
    mh = g_blk * t                            # packed rows per lane-half

    # Two contiguous group halves; collapse (g, T) -> rows (free when T % 8 == 0).
    x0 = x_ref[0].reshape(mh, dl)
    x1 = x_ref[1].reshape(mh, dl)
    # Lane-concat at a 128-lane (vreg) boundary: free, no lane shuffles.
    xp = jnp.concatenate([x0, x1], axis=-1).astype(matmul_dtype)      # (Mh, 2*DL)

    # Shrink (LinearTransform, no bias) for both halves in one block-diag matmul.
    hp = jnp.dot(xp, wshd_ref[...], preferred_element_type=jnp.float32)  # (Mh, 2*DP) f32

    wl = wl_ref[...]                                                   # (LORDER, 2*DP)
    wr = wr_ref[...]

    # Narrow time index per packed row; masks broadcast lane-wise inside where().
    t_col = lax.broadcasted_iota(jnp.int32, (mh, 1), 0) % t

    # FSMN memory: identity folded into wl[0]; remaining taps are sublane rolls
    # masked so they never leak across a (batch, channel) group boundary.
    mem = hp * wl[0:1, :]
    for j in range(1, lorder):
        sh = j * lstride
        if sh >= t:
            continue                          # tap reads only zero padding
        tap = jnp.where(t_col >= sh, pltpu.roll(hp, shift=sh, axis=0), 0.0)
        mem = mem + tap * wl[j:j + 1, :]
    for k in range(rorder):
        sh = (k + 1) * rstride
        if sh >= t:
            continue
        tap = jnp.where(t_col < t - sh, pltpu.roll(hp, shift=mh - sh, axis=0), 0.0)
        mem = mem + tap * wr[k:k + 1, :]

    # Expand (AffineTransform) + ReLU, block-diag so both halves come out in
    # separate 128-lane slabs (the lane split below is vreg-aligned -> free).
    yp = jnp.dot(mem.astype(matmul_dtype), wexd_ref[...],
                 preferred_element_type=jnp.float32) + bexd_ref[...]   # (Mh, 2*DL)
    yp = jnp.maximum(yp, 0.0)

    o_ref[0] = yp[:, :dl].reshape(g_blk, t, dl).astype(o_ref.dtype)
    o_ref[1] = yp[:, dl:].reshape(g_blk, t, dl).astype(o_ref.dtype)


def fsmn_unit_forward(x_btcf, w_shrink, conv_left_w, conv_right_w, w_expand,
                      b_expand, *, rows_per_block=2048, matmul_dtype=None):
    """x_btcf: (B, T, C, DIMLINEAR) -> (B, T, C, DIMLINEAR).

    rows_per_block: target packed rows (per lane-half) per grid step.  2048 at
                    f32 gives ~8 MiB of double-buffered VMEM — fits the default
                    scoped limit on v5e/v6e/v7x.
    matmul_dtype  : dtype fed to the MXU (weights + activations).  Pass
                    jnp.bfloat16 on any generation (incl. v5e, whose MXU is
                    bf16-native) to halve input DMA bytes and raise MXU rate;
                    tap math and accumulation stay f32.  Default f32 matches
                    the PyTorch module within tolerance.
    """
    b, t, c, dl = x_btcf.shape
    dp = w_shrink.shape[0]
    lorder = conv_left_w.shape[2]
    rorder = conv_right_w.shape[2]
    out_dtype = x_btcf.dtype
    if matmul_dtype is None:
        matmul_dtype = x_btcf.dtype

    # ---- Layout: (B, T, C, DL) -> (G, T, DL) with G = B*C, then split G into
    # two contiguous lane-halves -> (2, Gh, T, DL).  Blocks are (T, 128)-dense.
    g = b * c
    xg = jnp.transpose(x_btcf, (0, 2, 1, 3)).reshape(g, t, dl)

    gh = pl.cdiv(g, 2)                                    # groups per lane-half
    g_blk = max(1, min(gh, rows_per_block // max(t, 1)))  # groups/half per block
    steps = pl.cdiv(gh, g_blk)
    if steps < 4:                        # expose >=2 steps per v7x TensorCore
        g_alt = max(1, pl.cdiv(gh, 4))   # ...but only if blocks stay big enough
        if g_alt * t >= 512:
            g_blk = g_alt
    steps = pl.cdiv(gh, g_blk)
    gh_pad = steps * g_blk
    g_pad = 2 * gh_pad

    if g_pad != g:
        xg = jnp.pad(xg, ((0, g_pad - g), (0, 0), (0, 0)))
    xs = xg.reshape(2, gh_pad, t, dl)
    if xs.dtype != matmul_dtype:
        xs = xs.astype(matmul_dtype)     # actually halves input DMA on bf16 path

    # ---- Parameters (block-diagonal so two groups share one 128-lane pipe).
    wsh_t = jnp.transpose(w_shrink)                       # (DL, DP)
    wex_t = jnp.transpose(w_expand)                       # (DP, DL)
    zsh = jnp.zeros_like(wsh_t)
    zex = jnp.zeros_like(wex_t)
    wshd = jnp.block([[wsh_t, zsh], [zsh, wsh_t]]).astype(matmul_dtype)   # (2DL, 2DP)
    wexd = jnp.block([[wex_t, zex], [zex, wex_t]]).astype(matmul_dtype)   # (2DP, 2DL)
    bexd = jnp.tile(b_expand.reshape(1, dl), (1, 2)).astype(jnp.float32)  # (1, 2DL)

    # left taps: wl[j, d] multiplies frame t - j*lstride; fold identity into wl[0].
    wl = jnp.transpose(conv_left_w[:, 0, ::-1, 0]).astype(jnp.float32)    # (LORDER, DP)
    wl = wl.at[0].add(1.0)
    wr = jnp.transpose(conv_right_w[:, 0, :, 0]).astype(jnp.float32)      # (RORDER, DP)
    wl2 = jnp.tile(wl, (1, 2))                                            # (LORDER, 2DP)
    wr2 = jnp.tile(wr, (1, 2))                                            # (RORDER, 2DP)

    kernel = functools.partial(
        _fsmn_unit_kernel, t=t, lorder=lorder, rorder=rorder,
        lstride=LSTRIDE, rstride=RSTRIDE, matmul_dtype=matmul_dtype)

    out = pl.pallas_call(
        kernel,
        out_shape=jax.ShapeDtypeStruct((2, gh_pad, t, dl), out_dtype),
        grid_spec=pltpu.PrefetchScalarGridSpec(
            num_scalar_prefetch=0,
            grid=(steps,),
            in_specs=[
                pl.BlockSpec((2, g_blk, t, dl), lambda i: (0, i, 0, 0)),
                pl.BlockSpec((2 * dl, 2 * dp), lambda i: (0, 0)),
                pl.BlockSpec((lorder, 2 * dp), lambda i: (0, 0)),
                pl.BlockSpec((rorder, 2 * dp), lambda i: (0, 0)),
                pl.BlockSpec((2 * dp, 2 * dl), lambda i: (0, 0)),
                pl.BlockSpec((1, 2 * dl), lambda i: (0, 0)),
            ],
            out_specs=pl.BlockSpec((2, g_blk, t, dl), lambda i: (0, i, 0, 0)),
        ),
        compiler_params=pltpu.CompilerParams(
            dimension_semantics=("parallel",)),
    )(xs, wshd, wl2, wr2, wexd, bexd)

    # ---- Layout back: (2, Gh, T, DL) -> (B, T, C, DL); drop padded groups.
    out = out.reshape(g_pad, t, dl)[:g].reshape(b, c, t, dl)
    return jnp.transpose(out, (0, 2, 1, 3))


def fsmn_unit_reference(x_btcf, w_shrink, conv_left_w, conv_right_w, w_expand, b_expand):
    """Pure-JAX reference mirroring the PyTorch forward."""
    b, t, c, dl = x_btcf.shape
    outs = []
    for n in range(c):
        h = x_btcf[:, :, n, :] @ w_shrink.T                      # (B, T, DP)
        mem = h
        for j in range(LORDER):
            s = j * LSTRIDE
            w = conv_left_w[:, 0, LORDER - 1 - j, 0]             # (DP,)
            shifted = jnp.pad(h, ((0, 0), (s, 0), (0, 0)))[:, :t, :]
            mem = mem + shifted * w[None, None, :]
        for k in range(RORDER):
            s = (k + 1) * RSTRIDE
            w = conv_right_w[:, 0, k, 0]
            shifted = jnp.pad(h, ((0, 0), (0, s), (0, 0)))[:, s:, :]
            mem = mem + shifted * w[None, None, :]
        y = jnp.maximum(mem @ w_expand.T + b_expand[None, None, :], 0.0)
        outs.append(y)
    return jnp.stack(outs, axis=2)


if __name__ == "__main__":
    key = jax.random.PRNGKey(0)
    kx, k1, k2, k3, k4, k5 = jax.random.split(key, 6)

    # Deterministic synthetic parameters (shapes follow the PyTorch submodules).
    w_shrink = jax.random.normal(k1, (DIMPROJ, DIMLINEAR), jnp.float32) * 0.05
    conv_left_w = jax.random.normal(k2, (DIMPROJ, 1, LORDER, 1), jnp.float32) * 0.05
    conv_right_w = jax.random.normal(k3, (DIMPROJ, 1, RORDER, 1), jnp.float32) * 0.05
    w_expand = jax.random.normal(k4, (DIMLINEAR, DIMPROJ), jnp.float32) * 0.05
    b_expand = jax.random.normal(k5, (DIMLINEAR,), jnp.float32) * 0.05

    # Input: (batch, time, channel, feature)
    x = jax.random.normal(kx, (B, T, C, DIMLINEAR), jnp.float32)

    out = fsmn_unit_forward(x, w_shrink, conv_left_w, conv_right_w, w_expand, b_expand)
    out = jax.block_until_ready(out)

    ref = fsmn_unit_reference(x, w_shrink, conv_left_w, conv_right_w, w_expand, b_expand)
    assert out.shape == x.shape
    assert jnp.allclose(out, ref, atol=1e-4, rtol=1e-4), "mismatch vs reference"

    print("KERNEL_OK")
</pallas_src>

<mosaic_0001>
module attributes {stable_mosaic.version = 11 : i64} {
  func.func @_fsmn_unit_kernel(%arg0: i32, %arg1: memref<2x3x16x128xf32, #tpu.memory_space<vmem>>, %arg2: memref<256x128xf32, #tpu.memory_space<vmem>>, %arg3: memref<20x128xf32, #tpu.memory_space<vmem>>, %arg4: memref<1x128xf32, #tpu.memory_space<vmem>>, %arg5: memref<128x256xf32, #tpu.memory_space<vmem>>, %arg6: memref<1x256xf32, #tpu.memory_space<vmem>>, %arg7: memref<2x3x16x128xf32, #tpu.memory_space<vmem>>) attributes {dimension_semantics = [#tpu.dimension_semantics<parallel>], iteration_bounds = array<i64: 1>, scalar_prefetch = 0 : i64, scratch_operands = 0 : i64, tpu.core_type = #tpu.core_type<tc>, window_params = [{transform_indices = @transform_0, window_bounds = array<i64: 2, 3, 16, 128>}, {pipeline_mode = #tpu.pipeline_mode<synchronous>, transform_indices = @transform_1, window_bounds = array<i64: 256, 128>}, {pipeline_mode = #tpu.pipeline_mode<synchronous>, transform_indices = @transform_2, window_bounds = array<i64: 20, 128>}, {pipeline_mode = #tpu.pipeline_mode<synchronous>, transform_indices = @transform_3, window_bounds = array<i64: 1, 128>}, {pipeline_mode = #tpu.pipeline_mode<synchronous>, transform_indices = @transform_4, window_bounds = array<i64: 128, 256>}, {pipeline_mode = #tpu.pipeline_mode<synchronous>, transform_indices = @transform_5, window_bounds = array<i64: 1, 256>}, {transform_indices = @transform_6, window_bounds = array<i64: 2, 3, 16, 128>}]} {
    %c0 = arith.constant 0 : index
    %c0_0 = arith.constant 0 : index
    %c0_1 = arith.constant 0 : index
    %c0_2 = arith.constant 0 : index
    %0 = vector.load %arg1[%c0, %c0_0, %c0_1, %c0_2] : memref<2x3x16x128xf32, #tpu.memory_space<vmem>>, vector<1x3x16x128xf32>
    %1 = vector.shape_cast %0 : vector<1x3x16x128xf32> to vector<3x16x128xf32>
    %2 = vector.shape_cast %1 : vector<3x16x128xf32> to vector<48x128xf32>
    %c1 = arith.constant 1 : index
    %c0_3 = arith.constant 0 : index
    %c0_4 = arith.constant 0 : index
    %c0_5 = arith.constant 0 : index
    %3 = vector.load %arg1[%c1, %c0_3, %c0_4, %c0_5] : memref<2x3x16x128xf32, #tpu.memory_space<vmem>>, vector<1x3x16x128xf32>
    %4 = vector.shape_cast %3 : vector<1x3x16x128xf32> to vector<3x16x128xf32>
    %5 = vector.shape_cast %4 : vector<3x16x128xf32> to vector<48x128xf32>
    %6 = tpu.concatenate %2, %5 in 1 : vector<48x128xf32>, vector<48x128xf32> -> vector<48x256xf32>
    %c0_6 = arith.constant 0 : index
    %c0_7 = arith.constant 0 : index
    %7 = vector.load %arg2[%c0_6, %c0_7] : memref<256x128xf32, #tpu.memory_space<vmem>>, vector<256x128xf32>
    %cst = arith.constant dense<0.000000e+00> : vector<48x128xf32>
    %8 = tpu.matmul %6, %7, %cst {dimension_numbers = #tpu.dot_dimension_numbers<[1], [0], [0], [1], [0, 0, 1, 1], [], []>} : vector<48x256xf32>, vector<256x128xf32>, vector<48x128xf32> -> vector<48x128xf32>
    %c0_8 = arith.constant 0 : index
    %c0_9 = arith.constant 0 : index
    %9 = vector.load %arg3[%c0_8, %c0_9] : memref<20x128xf32, #tpu.memory_space<vmem>>, vector<20x128xf32>
    %c0_10 = arith.constant 0 : index
    %c0_11 = arith.constant 0 : index
    %10 = vector.load %arg4[%c0_10, %c0_11] : memref<1x128xf32, #tpu.memory_space<vmem>>, vector<1x128xf32>
    %11 = tpu.iota {dimensions = array<i32: 0>} : vector<48x1xi32>
    %c16_i32 = arith.constant 16 : i32
    %c0_i32 = arith.constant 0 : i32
    %12 = arith.cmpi eq, %c16_i32, %c0_i32 : i32
    %c1_i32 = arith.constant 1 : i32
    %13 = arith.select %12, %c1_i32, %c16_i32 : i32
    %14 = vector.broadcast %13 : i32 to vector<48x1xi32>
    %15 = arith.remsi %11, %14 : vector<48x1xi32>
    %c0_i32_12 = arith.constant 0 : i32
    %16 = vector.broadcast %c0_i32_12 : i32 to vector<48x1xi32>
    %17 = arith.cmpi ne, %15, %16 : vector<48x1xi32>
    %c0_i32_13 = arith.constant 0 : i32
    %18 = vector.broadcast %c0_i32_13 : i32 to vector<48x1xi32>
    %19 = arith.cmpi slt, %15, %18 : vector<48x1xi32>
    %c0_i32_14 = arith.constant 0 : i32
    %20 = arith.cmpi slt, %13, %c0_i32_14 : i32
    %21 = vector.broadcast %20 : i1 to vector<48x1xi1>
    %22 = vector.broadcast %21 : vector<48x1xi1> to vector<48x1xi1>
    %23 = arith.xori %19, %22 : vector<48x1xi1>
    %24 = arith.andi %23, %17 : vector<48x1xi1>
    %25 = vector.broadcast %13 : i32 to vector<48x1xi32>
    %26 = arith.addi %15, %25 : vector<48x1xi32>
    %27 = arith.select %24, %26, %15 : vector<48x1xi1>, vector<48x1xi32>
    %28 = vector.extract_strided_slice %9 {offsets = [0, 0], sizes = [1, 128], strides = [1, 1]} : vector<20x128xf32> to vector<1x128xf32>
    %29 = vector.broadcast %28 : vector<1x128xf32> to vector<48x128xf32>
    %30 = arith.mulf %8, %29 : vector<48x128xf32>
    %c1_i32_15 = arith.constant 1 : i32
    %31 = vector.broadcast %c1_i32_15 : i32 to vector<48x1xi32>
    %32 = arith.cmpi sge, %27, %31 : vector<48x1xi32>
    %c1_i32_16 = arith.constant 1 : i32
    %33 = tpu.dynamic_rotate %8 by %c1_i32_16 dim 0 : vector<48x128xf32>, i32 -> vector<48x128xf32>
    %cst_17 = arith.constant 0.000000e+00 : f32
    %34 = vector.shape_cast %32 : vector<48x1xi1> to vector<48x1xi1>
    %35 = vector.broadcast %34 : vector<48x1xi1> to vector<48x128xi1>
    %36 = vector.broadcast %cst_17 : f32 to vector<48x128xf32>
    %37 = arith.select %35, %33, %36 : vector<48x128xi1>, vector<48x128xf32>
    %38 = vector.extract_strided_slice %9 {offsets = [1, 0], sizes = [1, 128], strides = [1, 1]} : vector<20x128xf32> to vector<1x128xf32>
    %39 = vector.broadcast %38 : vector<1x128xf32> to vector<48x128xf32>
    %40 = arith.mulf %37, %39 : vector<48x128xf32>
    %41 = arith.addf %30, %40 : vector<48x128xf32>
    %c2_i32 = arith.constant 2 : i32
    %42 = vector.broadcast %c2_i32 : i32 to vector<48x1xi32>
    %43 = arith.cmpi sge, %27, %42 : vector<48x1xi32>
    %c2_i32_18 = arith.constant 2 : i32
    %44 = tpu.dynamic_rotate %8 by %c2_i32_18 dim 0 : vector<48x128xf32>, i32 -> vector<48x128xf32>
    %cst_19 = arith.constant 0.000000e+00 : f32
    %45 = vector.shape_cast %43 : vector<48x1xi1> to vector<48x1xi1>
    %46 = vector.broadcast %45 : vector<48x1xi1> to vector<48x128xi1>
    %47 = vector.broadcast %cst_19 : f32 to vector<48x128xf32>
    %48 = arith.select %46, %44, %47 : vector<48x128xi1>, vector<48x128xf32>
    %49 = vector.extract_strided_slice %9 {offsets = [2, 0], sizes = [1, 128], strides = [1, 1]} : vector<20x128xf32> to vector<1x128xf32>
    %50 = vector.broadcast %49 : vector<1x128xf32> to vector<48x128xf32>
    %51 = arith.mulf %48, %50 : vector<48x128xf32>
    %52 = arith.addf %41, %51 : vector<48x128xf32>
    %c3_i32 = arith.constant 3 : i32
    %53 = vector.broadcast %c3_i32 : i32 to vector<48x1xi32>
    %54 = arith.cmpi sge, %27, %53 : vector<48x1xi32>
    %c3_i32_20 = arith.constant 3 : i32
    %55 = tpu.dynamic_rotate %8 by %c3_i32_20 dim 0 : vector<48x128xf32>, i32 -> vector<48x128xf32>
    %cst_21 = arith.constant 0.000000e+00 : f32
    %56 = vector.shape_cast %54 : vector<48x1xi1> to vector<48x1xi1>
    %57 = vector.broadcast %56 : vector<48x1xi1> to vector<48x128xi1>
    %58 = vector.broadcast %cst_21 : f32 to vector<48x128xf32>
    %59 = arith.select %57, %55, %58 : vector<48x128xi1>, vector<48x128xf32>
    %60 = vector.extract_strided_slice %9 {offsets = [3, 0], sizes = [1, 128], strides = [1, 1]} : vector<20x128xf32> to vector<1x128xf32>
    %61 = vector.broadcast %60 : vector<1x128xf32> to vector<48x128xf32>
    %62 = arith.mulf %59, %61 : vector<48x128xf32>
    %63 = arith.addf %52, %62 : vector<48x128xf32>
    %c4_i32 = arith.constant 4 : i32
    %64 = vector.broadcast %c4_i32 : i32 to vector<48x1xi32>
    %65 = arith.cmpi sge, %27, %64 : vector<48x1xi32>
    %c4_i32_22 = arith.constant 4 : i32
    %66 = tpu.dynamic_rotate %8 by %c4_i32_22 dim 0 : vector<48x128xf32>, i32 -> vector<48x128xf32>
    %cst_23 = arith.constant 0.000000e+00 : f32
    %67 = vector.shape_cast %65 : vector<48x1xi1> to vector<48x1xi1>
    %68 = vector.broadcast %67 : vector<48x1xi1> to vector<48x128xi1>
    %69 = vector.broadcast %cst_23 : f32 to vector<48x128xf32>
    %70 = arith.select %68, %66, %69 : vector<48x128xi1>, vector<48x128xf32>
    %71 = vector.extract_strided_slice %9 {offsets = [4, 0], sizes = [1, 128], strides = [1, 1]} : vector<20x128xf32> to vector<1x128xf32>
    %72 = vector.broadcast %71 : vector<1x128xf32> to vector<48x128xf32>
    %73 = arith.mulf %70, %72 : vector<48x128xf32>
    %74 = arith.addf %63, %73 : vector<48x128xf32>
    %c5_i32 = arith.constant 5 : i32
    %75 = vector.broadcast %c5_i32 : i32 to vector<48x1xi32>
    %76 = arith.cmpi sge, %27, %75 : vector<48x1xi32>
    %c5_i32_24 = arith.constant 5 : i32
    %77 = tpu.dynamic_rotate %8 by %c5_i32_24 dim 0 : vector<48x128xf32>, i32 -> vector<48x128xf32>
    %cst_25 = arith.constant 0.000000e+00 : f32
    %78 = vector.shape_cast %76 : vector<48x1xi1> to vector<48x1xi1>
    %79 = vector.broadcast %78 : vector<48x1xi1> to vector<48x128xi1>
    %80 = vector.broadcast %cst_25 : f32 to vector<48x128xf32>
    %81 = arith.select %79, %77, %80 : vector<48x128xi1>, vector<48x128xf32>
    %82 = vector.extract_strided_slice %9 {offsets = [5, 0], sizes = [1, 128], strides = [1, 1]} : vector<20x128xf32> to vector<1x128xf32>
    %83 = vector.broadcast %82 : vector<1x128xf32> to vector<48x128xf32>
    %84 = arith.mulf %81, %83 : vector<48x128xf32>
    %85 = arith.addf %74, %84 : vector<48x128xf32>
    %c6_i32 = arith.constant 6 : i32
    %86 = vector.broadcast %c6_i32 : i32 to vector<48x1xi32>
    %87 = arith.cmpi sge, %27, %86 : vector<48x1xi32>
    %c6_i32_26 = arith.constant 6 : i32
    %88 = tpu.dynamic_rotate %8 by %c6_i32_26 dim 0 : vector<48x128xf32>, i32 -> vector<48x128xf32>
    %cst_27 = arith.constant 0.000000e+00 : f32
    %89 = vector.shape_cast %87 : vector<48x1xi1> to vector<48x1xi1>
    %90 = vector.broadcast %89 : vector<48x1xi1> to vector<48x128xi1>
    %91 = vector.broadcast %cst_27 : f32 to vector<48x128xf32>
    %92 = arith.select %90, %88, %91 : vector<48x128xi1>, vector<48x128xf32>
    %93 = vector.extract_strided_slice %9 {offsets = [6, 0], sizes = [1, 128], strides = [1, 1]} : vector<20x128xf32> to vector<1x128xf32>
    %94 = vector.broadcast %93 : vector<1x128xf32> to vector<48x128xf32>
    %95 = arith.mulf %92, %94 : vector<48x128xf32>
    %96 = arith.addf %85, %95 : vector<48x128xf32>
    %c7_i32 = arith.constant 7 : i32
    %97 = vector.broadcast %c7_i32 : i32 to vector<48x1xi32>
    %98 = arith.cmpi sge, %27, %97 : vector<48x1xi32>
    %c7_i32_28 = arith.constant 7 : i32
    %99 = tpu.dynamic_rotate %8 by %c7_i32_28 dim 0 : vector<48x128xf32>, i32 -> vector<48x128xf32>
    %cst_29 = arith.constant 0.000000e+00 : f32
    %100 = vector.shape_cast %98 : vector<48x1xi1> to vector<48x1xi1>
    %101 = vector.broadcast %100 : vector<48x1xi1> to vector<48x128xi1>
    %102 = vector.broadcast %cst_29 : f32 to vector<48x128xf32>
    %103 = arith.select %101, %99, %102 : vector<48x128xi1>, vector<48x128xf32>
    %104 = vector.extract_strided_slice %9 {offsets = [7, 0], sizes = [1, 128], strides = [1, 1]} : vector<20x128xf32> to vector<1x128xf32>
    %105 = vector.broadcast %104 : vector<1x128xf32> to vector<48x128xf32>
    %106 = arith.mulf %103, %105 : vector<48x128xf32>
    %107 = arith.addf %96, %106 : vector<48x128xf32>
    %c8_i32 = arith.constant 8 : i32
    %108 = vector.broadcast %c8_i32 : i32 to vector<48x1xi32>
    %109 = arith.cmpi sge, %27, %108 : vector<48x1xi32>
    %c8_i32_30 = arith.constant 8 : i32
    %110 = tpu.dynamic_rotate %8 by %c8_i32_30 dim 0 : vector<48x128xf32>, i32 -> vector<48x128xf32>
    %cst_31 = arith.constant 0.000000e+00 : f32
    %111 = vector.shape_cast %109 : vector<48x1xi1> to vector<48x1xi1>
    %112 = vector.broadcast %111 : vector<48x1xi1> to vector<48x128xi1>
    %113 = vector.broadcast %cst_31 : f32 to vector<48x128xf32>
    %114 = arith.select %112, %110, %113 : vector<48x128xi1>, vector<48x128xf32>
    %115 = vector.extract_strided_slice %9 {offsets = [8, 0], sizes = [1, 128], strides = [1, 1]} : vector<20x128xf32> to vector<1x128xf32>
    %116 = vector.broadcast %115 : vector<1x128xf32> to vector<48x128xf32>
    %117 = arith.mulf %114, %116 : vector<48x128xf32>
    %118 = arith.addf %107, %117 : vector<48x128xf32>
    %c9_i32 = arith.constant 9 : i32
    %119 = vector.broadcast %c9_i32 : i32 to vector<48x1xi32>
    %120 = arith.cmpi sge, %27, %119 : vector<48x1xi32>
    %c9_i32_32 = arith.constant 9 : i32
    %121 = tpu.dynamic_rotate %8 by %c9_i32_32 dim 0 : vector<48x128xf32>, i32 -> vector<48x128xf32>
    %cst_33 = arith.constant 0.000000e+00 : f32
    %122 = vector.shape_cast %120 : vector<48x1xi1> to vector<48x1xi1>
    %123 = vector.broadcast %122 : vector<48x1xi1> to vector<48x128xi1>
    %124 = vector.broadcast %cst_33 : f32 to vector<48x128xf32>
    %125 = arith.select %123, %121, %124 : vector<48x128xi1>, vector<48x128xf32>
    %126 = vector.extract_strided_slice %9 {offsets = [9, 0], sizes = [1, 128], strides = [1, 1]} : vector<20x128xf32> to vector<1x128xf32>
    %127 = vector.broadcast %126 : vector<1x128xf32> to vector<48x128xf32>
    %128 = arith.mulf %125, %127 : vector<48x128xf32>
    %129 = arith.addf %118, %128 : vector<48x128xf32>
    %c10_i32 = arith.constant 10 : i32
    %130 = vector.broadcast %c10_i32 : i32 to vector<48x1xi32>
    %131 = arith.cmpi sge, %27, %130 : vector<48x1xi32>
    %c10_i32_34 = arith.constant 10 : i32
    %132 = tpu.dynamic_rotate %8 by %c10_i32_34 dim 0 : vector<48x128xf32>, i32 -> vector<48x128xf32>
    %cst_35 = arith.constant 0.000000e+00 : f32
    %133 = vector.shape_cast %131 : vector<48x1xi1> to vector<48x1xi1>
    %134 = vector.broadcast %133 : vector<48x1xi1> to vector<48x128xi1>
    %135 = vector.broadcast %cst_35 : f32 to vector<48x128xf32>
    %136 = arith.select %134, %132, %135 : vector<48x128xi1>, vector<48x128xf32>
    %137 = vector.extract_strided_slice %9 {offsets = [10, 0], sizes = [1, 128], strides = [1, 1]} : vector<20x128xf32> to vector<1x128xf32>
    %138 = vector.broadcast %137 : vector<1x128xf32> to vector<48x128xf32>
    %139 = arith.mulf %136, %138 : vector<48x128xf32>
    %140 = arith.addf %129, %139 : vector<48x128xf32>
    %c11_i32 = arith.constant 11 : i32
    %141 = vector.broadcast %c11_i32 : i32 to vector<48x1xi32>
    %142 = arith.cmpi sge, %27, %141 : vector<48x1xi32>
    %c11_i32_36 = arith.constant 11 : i32
    %143 = tpu.dynamic_rotate %8 by %c11_i32_36 dim 0 : vector<48x128xf32>, i32 -> vector<48x128xf32>
    %cst_37 = arith.constant 0.000000e+00 : f32
    %144 = vector.shape_cast %142 : vector<48x1xi1> to vector<48x1xi1>
    %145 = vector.broadcast %144 : vector<48x1xi1> to vector<48x128xi1>
    %146 = vector.broadcast %cst_37 : f32 to vector<48x128xf32>
    %147 = arith.select %145, %143, %146 : vector<48x128xi1>, vector<48x128xf32>
    %148 = vector.extract_strided_slice %9 {offsets = [11, 0], sizes = [1, 128], strides = [1, 1]} : vector<20x128xf32> to vector<1x128xf32>
    %149 = vector.broadcast %148 : vector<1x128xf32> to vector<48x128xf32>
    %150 = arith.mulf %147, %149 : vector<48x128xf32>
    %151 = arith.addf %140, %150 : vector<48x128xf32>
    %c12_i32 = arith.constant 12 : i32
    %152 = vector.broadcast %c12_i32 : i32 to vector<48x1xi32>
    %153 = arith.cmpi sge, %27, %152 : vector<48x1xi32>
    %c12_i32_38 = arith.constant 12 : i32
    %154 = tpu.dynamic_rotate %8 by %c12_i32_38 dim 0 : vector<48x128xf32>, i32 -> vector<48x128xf32>
    %cst_39 = arith.constant 0.000000e+00 : f32
    %155 = vector.shape_cast %153 : vector<48x1xi1> to vector<48x1xi1>
    %156 = vector.broadcast %155 : vector<48x1xi1> to vector<48x128xi1>
    %157 = vector.broadcast %cst_39 : f32 to vector<48x128xf32>
    %158 = arith.select %156, %154, %157 : vector<48x128xi1>, vector<48x128xf32>
    %159 = vector.extract_strided_slice %9 {offsets = [12, 0], sizes = [1, 128], strides = [1, 1]} : vector<20x128xf32> to vector<1x128xf32>
    %160 = vector.broadcast %159 : vector<1x128xf32> to vector<48x128xf32>
    %161 = arith.mulf %158, %160 : vector<48x128xf32>
    %162 = arith.addf %151, %161 : vector<48x128xf32>
    %c13_i32 = arith.constant 13 : i32
    %163 = vector.broadcast %c13_i32 : i32 to vector<48x1xi32>
    %164 = arith.cmpi sge, %27, %163 : vector<48x1xi32>
    %c13_i32_40 = arith.constant 13 : i32
    %165 = tpu.dynamic_rotate %8 by %c13_i32_40 dim 0 : vector<48x128xf32>, i32 -> vector<48x128xf32>
    %cst_41 = arith.constant 0.000000e+00 : f32
    %166 = vector.shape_cast %164 : vector<48x1xi1> to vector<48x1xi1>
    %167 = vector.broadcast %166 : vector<48x1xi1> to vector<48x128xi1>
    %168 = vector.broadcast %cst_41 : f32 to vector<48x128xf32>
    %169 = arith.select %167, %165, %168 : vector<48x128xi1>, vector<48x128xf32>
    %170 = vector.extract_strided_slice %9 {offsets = [13, 0], sizes = [1, 128], strides = [1, 1]} : vector<20x128xf32> to vector<1x128xf32>
    %171 = vector.broadcast %170 : vector<1x128xf32> to vector<48x128xf32>
    %172 = arith.mulf %169, %171 : vector<48x128xf32>
    %173 = arith.addf %162, %172 : vector<48x128xf32>
    %c14_i32 = arith.constant 14 : i32
    %174 = vector.broadcast %c14_i32 : i32 to vector<48x1xi32>
    %175 = arith.cmpi sge, %27, %174 : vector<48x1xi32>
    %c14_i32_42 = arith.constant 14 : i32
    %176 = tpu.dynamic_rotate %8 by %c14_i32_42 dim 0 : vector<48x128xf32>, i32 -> vector<48x128xf32>
    %cst_43 = arith.constant 0.000000e+00 : f32
    %177 = vector.shape_cast %175 : vector<48x1xi1> to vector<48x1xi1>
    %178 = vector.broadcast %177 : vector<48x1xi1> to vector<48x128xi1>
    %179 = vector.broadcast %cst_43 : f32 to vector<48x128xf32>
    %180 = arith.select %178, %176, %179 : vector<48x128xi1>, vector<48x128xf32>
    %181 = vector.extract_strided_slice %9 {offsets = [14, 0], sizes = [1, 128], strides = [1, 1]} : vector<20x128xf32> to vector<1x128xf32>
    %182 = vector.broadcast %181 : vector<1x128xf32> to vector<48x128xf32>
    %183 = arith.mulf %180, %182 : vector<48x128xf32>
    %184 = arith.addf %173, %183 : vector<48x128xf32>
    %c15_i32 = arith.constant 15 : i32
    %185 = vector.broadcast %c15_i32 : i32 to vector<48x1xi32>
    %186 = arith.cmpi sge, %27, %185 : vector<48x1xi32>
    %c15_i32_44 = arith.constant 15 : i32
    %187 = tpu.dynamic_rotate %8 by %c15_i32_44 dim 0 : vector<48x128xf32>, i32 -> vector<48x128xf32>
    %cst_45 = arith.constant 0.000000e+00 : f32
    %188 = vector.shape_cast %186 : vector<48x1xi1> to vector<48x1xi1>
    %189 = vector.broadcast %188 : vector<48x1xi1> to vector<48x128xi1>
    %190 = vector.broadcast %cst_45 : f32 to vector<48x128xf32>
    %191 = arith.select %189, %187, %190 : vector<48x128xi1>, vector<48x128xf32>
    %192 = vector.extract_strided_slice %9 {offsets = [15, 0], sizes = [1, 128], strides = [1, 1]} : vector<20x128xf32> to vector<1x128xf32>
    %193 = vector.broadcast %192 : vector<1x128xf32> to vector<48x128xf32>
    %194 = arith.mulf %191, %193 : vector<48x128xf32>
    %195 = arith.addf %184, %194 : vector<48x128xf32>
    %c15_i32_46 = arith.constant 15 : i32
    %196 = vector.broadcast %c15_i32_46 : i32 to vector<48x1xi32>
    %197 = arith.cmpi slt, %27, %196 : vector<48x1xi32>
    %c47_i32 = arith.constant 47 : i32
    %198 = tpu.dynamic_rotate %8 by %c47_i32 dim 0 : vector<48x128xf32>, i32 -> vector<48x128xf32>
    %cst_47 = arith.constant 0.000000e+00 : f32
    %199 = vector.shape_cast %197 : vector<48x1xi1> to vector<48x1xi1>
    %200 = vector.broadcast %199 : vector<48x1xi1> to vector<48x128xi1>
    %201 = vector.broadcast %cst_47 : f32 to vector<48x128xf32>
    %202 = arith.select %200, %198, %201 : vector<48x128xi1>, vector<48x128xf32>
    %203 = vector.broadcast %10 : vector<1x128xf32> to vector<48x128xf32>
    %204 = arith.mulf %202, %203 : vector<48x128xf32>
    %205 = arith.addf %195, %204 : vector<48x128xf32>
    %c0_48 = arith.constant 0 : index
    %c0_49 = arith.constant 0 : index
    %206 = vector.load %arg5[%c0_48, %c0_49] : memref<128x256xf32, #tpu.memory_space<vmem>>, vector<128x256xf32>
    %cst_50 = arith.constant dense<0.000000e+00> : vector<48x256xf32>
    %207 = tpu.matmul %205, %206, %cst_50 {dimension_numbers = #tpu.dot_dimension_numbers<[1], [0], [0], [1], [0, 0, 1, 1], [], []>} : vector<48x128xf32>, vector<128x256xf32>, vector<48x256xf32> -> vector<48x256xf32>
    %c0_51 = arith.constant 0 : index
    %c0_52 = arith.constant 0 : index
    %208 = vector.load %arg6[%c0_51, %c0_52] : memref<1x256xf32, #tpu.memory_space<vmem>>, vector<1x256xf32>
    %209 = vector.broadcast %208 : vector<1x256xf32> to vector<48x256xf32>
    %210 = arith.addf %207, %209 : vector<48x256xf32>
    %cst_53 = arith.constant 0.000000e+00 : f32
    %211 = vector.broadcast %cst_53 : f32 to vector<48x256xf32>
    %212 = arith.maximumf %210, %211 : vector<48x256xf32>
    %213 = vector.extract_strided_slice %212 {offsets = [0, 0], sizes = [48, 128], strides = [1, 1]} : vector<48x256xf32> to vector<48x128xf32>
    %214 = vector.shape_cast %213 : vector<48x128xf32> to vector<3x16x128xf32>
    %c0_54 = arith.constant 0 : index
    %c0_55 = arith.constant 0 : index
    %c0_56 = arith.constant 0 : index
    %c0_57 = arith.constant 0 : index
    %215 = vector.load %arg7[%c0_54, %c0_55, %c0_56, %c0_57] : memref<2x3x16x128xf32, #tpu.memory_space<vmem>>, vector<1x3x16x128xf32>
    %216 = vector.shape_cast %215 : vector<1x3x16x128xf32> to vector<3x16x128xf32>
    %217 = vector.shape_cast %214 : vector<3x16x128xf32> to vector<1x3x16x128xf32>
    tpu.vector_store %arg7[%c0_54, %c0_55, %c0_56, %c0_57], %217 {strides = array<i32>} : memref<2x3x16x128xf32, #tpu.memory_space<vmem>>, vector<1x3x16x128xf32>,
    %218 = vector.extract_strided_slice %212 {offsets = [0, 128], sizes = [48, 128], strides = [1, 1]} : vector<48x256xf32> to vector<48x128xf32>
    %219 = vector.shape_cast %218 : vector<48x128xf32> to vector<3x16x128xf32>
    %c1_58 = arith.constant 1 : index
    %c0_59 = arith.constant 0 : index
    %c0_60 = arith.constant 0 : index
    %c0_61 = arith.constant 0 : index
    %220 = vector.load %arg7[%c1_58, %c0_59, %c0_60, %c0_61] : memref<2x3x16x128xf32, #tpu.memory_space<vmem>>, vector<1x3x16x128xf32>
    %221 = vector.shape_cast %220 : vector<1x3x16x128xf32> to vector<3x16x128xf32>
    %222 = vector.shape_cast %219 : vector<3x16x128xf32> to vector<1x3x16x128xf32>
    tpu.vector_store %arg7[%c1_58, %c0_59, %c0_60, %c0_61], %222 {strides = array<i32>} : memref<2x3x16x128xf32, #tpu.memory_space<vmem>>, vector<1x3x16x128xf32>,
    return
  }
  func.func @transform_0(%arg0: i32) -> (i32, i32, i32, i32) {
    %c0_i32 = arith.constant 0 : i32
    %c0_i32_0 = arith.constant 0 : i32
    %c0_i32_1 = arith.constant 0 : i32
    %c0_i32_2 = arith.constant 0 : i32
    return %c0_i32, %arg0, %c0_i32_0, %c0_i32_1 : i32, i32, i32, i32
  }
  func.func @transform_1(%arg0: i32) -> (i32, i32) {
    %c0_i32 = arith.constant 0 : i32
    %c0_i32_0 = arith.constant 0 : i32
    %c0_i32_1 = arith.constant 0 : i32
    return %c0_i32, %c0_i32_0 : i32, i32
  }
  func.func @transform_2(%arg0: i32) -> (i32, i32) {
    %c0_i32 = arith.constant 0 : i32
    %c0_i32_0 = arith.constant 0 : i32
    %c0_i32_1 = arith.constant 0 : i32
    return %c0_i32, %c0_i32_0 : i32, i32
  }
  func.func @transform_3(%arg0: i32) -> (i32, i32) {
    %c0_i32 = arith.constant 0 : i32
    %c0_i32_0 = arith.constant 0 : i32
    %c0_i32_1 = arith.constant 0 : i32
    return %c0_i32, %c0_i32_0 : i32, i32
  }
  func.func @transform_4(%arg0: i32) -> (i32, i32) {
    %c0_i32 = arith.constant 0 : i32
    %c0_i32_0 = arith.constant 0 : i32
    %c0_i32_1 = arith.constant 0 : i32
    return %c0_i32, %c0_i32_0 : i32, i32
  }
  func.func @transform_5(%arg0: i32) -> (i32, i32) {
    %c0_i32 = arith.constant 0 : i32
    %c0_i32_0 = arith.constant 0 : i32
    %c0_i32_1 = arith.constant 0 : i32
    return %c0_i32, %c0_i32_0 : i32, i32
  }
  func.func @transform_6(%arg0: i32) -> (i32, i32, i32, i32) {
    %c0_i32 = arith.constant 0 : i32
    %c0_i32_0 = arith.constant 0 : i32
    %c0_i32_1 = arith.constant 0 : i32
    %c0_i32_2 = arith.constant 0 : i32
    return %c0_i32, %arg0, %c0_i32_0, %c0_i32_1 : i32, i32, i32, i32
  }
}

</mosaic_0001>

<bundles_post_ra>
// kernel: tpu_custom_call.1
= control target key start
LH: loop header
LB: loop body
LE: loop exit
PB: predicated region body
PF: predicated region fallthrough
CT: control target
= control target key end

     0   :  { %11 = vsyncpa [#allocation3], 0  ;;  %s2309_s0 = inlined_call_operand.hbm [shape: f32[2,3,16,128], index: 0, kind: input, shape index: {}]   ;;  %s2310_s1 = inlined_call_operand.hbm [shape: f32[256,128], index: 1, kind: input, shape index: {}]   ;;  %s2311_s2 = inlined_call_operand.hbm [shape: f32[20,128], index: 2, kind: input, shape index: {}]   ;;  %s2312_s3 = inlined_call_operand.vmem [shape: f32[1,128], index: 3, kind: input, shape index: {}]   ;;  %s2313_s4 = inlined_call_operand.hbm [shape: f32[128,256], index: 4, kind: input, shape index: {}]   ;;  %s2314_s5 = inlined_call_operand.vmem [shape: f32[1,256], index: 5, kind: input, shape index: {}]   ;;  %s2315_s6 = inlined_call_operand.hbm [shape: f32[2,3,16,128], index: 6, kind: output, shape index: {}]  }
   0x1   :  { %12 = vsyncpa [#allocation6], 0 }
   0x2   :  { %13 = vsyncpa [#allocation9], 0 }
   0x3   :  { %14 = vsyncpa [#allocation4], 0  ;;  %s1476_s21 = smov [#allocation5]   ;;  %s1477_s23 = smov [#allocation2]  }
   0x4   :  { %s32_s22 = sshll.u32 %s1476_s21, 4  ;;  %s20_s24 = sshll.u32 %s1477_s23, 4  ;;  %s33_s22 = int_to_ptr.vmem [resolvable:$true] %s32_s22  ;;  %s1521_s24 = int_to_ptr.vmem [resolvable:$true] %s20_s24 }
   0x5   :  { %s1358_s27 = scalar_lea.hbm %s2310_s1, 4096 }
   0x6   :  { %p1359_p0 = scmp.ne.s32.totalorder %s2310_s1, %s1358_s27  ;;  %p1362_p1 = scmp.lt.u32.totalorder %s1358_s27, %s2310_s1 }
   0x8   :  { %p1364_p2 = pnand %p1362_p1, %p1359_p0 }
   0xa   :  { %1367 = shalt.err (!%p1364_p2)
}
   0xb   :  { %s1368_s8 = scalar_lea.vmem %s33_s22, 4096  ;;  %p1373_p4 = scmp.lt.s32.totalorder %s33_s22, %s33_s22 }
   0xc   :  { %p1369_p3 = scmp.ne.s32.totalorder %s33_s22, %s1368_s8  ;;  %p1374_p5 = scmp.lt.s32.totalorder %s1368_s8, %s1368_s8 }
   0xe   :  { %p1375_p6 = por %p1374_p5, %p1373_p4 }
  0x10   :  { %p1376_p7 = pnand %p1375_p6, %p1369_p3 }
  0x12   :  { %1379 = shalt.err (!%p1376_p7)
}
  0x13   :  { %s1478_s9 = smov 128   ;;  %s1479_s10 = smov 8  }
  0x14   :  { %38 = dma.hbm_to_vmem [thread:$0]  %s2310_s1, 4096, %s33_s22, [#allocation6], %s1478_s9, %s1478_s9, %s1479_s10  }
  0x15   :  { %s1380_s15 = scalar_lea.hbm %s2309_s0, 1536 }
  0x16   :  { %p1381_p8 = scmp.ne.s32.totalorder %s2309_s0, %s1380_s15  ;;  %p1384_p9 = scmp.lt.u32.totalorder %s1380_s15, %s2309_s0 }
  0x18   :  { %p1386_p10 = pnand %p1384_p9, %p1381_p8 }
  0x1a   :  { %1389 = shalt.err (!%p1386_p10)
}
  0x1b   :  { %s1390_s20 = scalar_lea.vmem %s1521_s24, 1536  ;;  %p1395_p12 = scmp.lt.s32.totalorder %s1521_s24, %s1521_s24 }
  0x1c   :  { %p1391_p11 = scmp.ne.s32.totalorder %s1521_s24, %s1390_s20  ;;  %p1396_p13 = scmp.lt.s32.totalorder %s1390_s20, %s1390_s20 }
  0x1e   :  { %p1397_p0 = por %p1396_p13, %p1395_p12 }
  0x20   :  { %p1398_p1 = pnand %p1397_p0, %p1391_p11 }
  0x22   :  { %1401 = shalt.err (!%p1398_p1)
}
  0x23   :  { %26 = dma.hbm_to_vmem [thread:$0]  %s2309_s0, 1536, %s1521_s24, [#allocation3], %s1478_s9, %s1478_s9, %s1479_s10  }
  0x24   :  { %s1480_s22 = smov [#allocation7]   ;;  %s1481_s25 = smov [#allocation8]  }
  0x25   :  { %s44_s23 = sshll.u32 %s1480_s22, 4  ;;  %s58_s26 = sshll.u32 %s1481_s25, 4  ;;  %s45_s23 = int_to_ptr.vmem [resolvable:$true] %s44_s23  ;;  %s1558_s26 = int_to_ptr.vmem [resolvable:$true] %s58_s26 }
  0x26   :  { %s1402_s29 = scalar_lea.hbm %s2311_s2, 384 }
  0x27   :  { %p1403_p2 = scmp.ne.s32.totalorder %s2311_s2, %s1402_s29  ;;  %p1406_p3 = scmp.lt.u32.totalorder %s1402_s29, %s2311_s2 }
  0x29   :  { %p1408_p4 = pnand %p1406_p3, %p1403_p2 }
  0x2b   :  { %1411 = shalt.err (!%p1408_p4)
}
  0x2c   :  { %s1412_s0 = scalar_lea.vmem %s45_s23, 384  ;;  %p1417_p6 = scmp.lt.s32.totalorder %s45_s23, %s45_s23 }
  0x2d   :  { %p1413_p5 = scmp.ne.s32.totalorder %s45_s23, %s1412_s0  ;;  %p1418_p7 = scmp.lt.s32.totalorder %s1412_s0, %s1412_s0 }
  0x2f   :  { %p1419_p8 = por %p1418_p7, %p1417_p6 }
  0x31   :  { %p1420_p9 = pnand %p1419_p8, %p1413_p5 }
  0x33   :  { %1423 = shalt.err (!%p1420_p9)
}
  0x34   :  { %50 = dma.hbm_to_vmem [thread:$0]  %s2311_s2, 384, %s45_s23, [#allocation6], %s1478_s9, %s1478_s9, %s1479_s10  }
  0x35   :  { %s1424_s15 = scalar_lea.hbm %s2313_s4, 4096 }
  0x36   :  { %p1425_p10 = scmp.ne.s32.totalorder %s2313_s4, %s1424_s15  ;;  %p1428_p11 = scmp.lt.u32.totalorder %s1424_s15, %s2313_s4 }
  0x38   :  { %p1430_p12 = pnand %p1428_p11, %p1425_p10 }
  0x3a   :  { %1433 = shalt.err (!%p1430_p12)
}
  0x3b   :  { %s1434_s20 = scalar_lea.vmem %s1558_s26, 4096  ;;  %p1439_p0 = scmp.lt.s32.totalorder %s1558_s26, %s1558_s26 }
  0x3c   :  { %p1435_p13 = scmp.ne.s32.totalorder %s1558_s26, %s1434_s20  ;;  %p1440_p1 = scmp.lt.s32.totalorder %s1434_s20, %s1434_s20 }
  0x3e   :  { %p1441_p2 = por %p1440_p1, %p1439_p0 }
  0x40   :  { %p1442_p3 = pnand %p1441_p2, %p1435_p13 }
  0x42   :  { %1445 = shalt.err (!%p1442_p3)
}
  0x43   :  { %s1482_s2 = smov 256   ;;  %s1483_s1 = smov 16  }
  0x44   :  { %64 = dma.hbm_to_vmem [thread:$0]  %s2313_s4, 4096, %s1558_s26, [#allocation9], %s1482_s2, %s1482_s2, %s1483_s1  }
  0x45   :  { %1468 = dma.done.wait [#allocation3], 1536  }
  0x46   :  { %1469 = vsyncadd [#allocation3], 4294965760 }
  0x47   :  { %1470 = dma.done.wait [#allocation6], 4480  }
  0x48   :  { %1471 = vsyncadd [#allocation6], 4294962816 }
  0x49   :  { %1472 = dma.done.wait [#allocation9], 4096  }
  0x4a   :  { %1473 = vsyncadd [#allocation9], 4294963200  ;;  %v108_v0 = vld [vmem:[#allocation5 + $0x80] sm:$0xff]  ;;  %v109_v1 = vld [vmem:[#allocation5 + $0x88] sm:$0xff] }
  0x4b   :  { %v92_v2 = vld [vmem:[#allocation5] sm:$0xff]  ;;  %v1284_v3 = vpack.c.bf16 %v109_v1, %v108_v0  ;;  %v93_v4 = vld [vmem:[#allocation5 + $0x8] sm:$0xff]  ;;  %v110_v5 = vld [vmem:[#allocation5 + $0x90] sm:$0xff] }
  0x4c   :  { %v111_v6 = vld [vmem:[#allocation5 + $0x98] sm:$0xff]  ;;  %v1286_v7 = vpack.c.bf16 %v93_v4, %v92_v2  ;;  %v94_v9 = vld [vmem:[#allocation5 + $0x10] sm:$0xff]  ;;  %v112_v11 = vld [vmem:[#allocation5 + $0xa0] sm:$0xff] }
  0x4d   :  { %v1288_v8 = vpack.c.bf16 %v111_v6, %v110_v5  ;;  %v95_v10 = vld [vmem:[#allocation5 + $0x18] sm:$0xff]  ;;  %1285 = vmatprep.subr.bf16.mxu0 %v1284_v3  ;;  %v113_v12 = vld [vmem:[#allocation5 + $0xa8] sm:$0xff]  ;;  %v96_v15 = vld [vmem:[#allocation5 + $0x20] sm:$0xff]  ;;  %v2316_v3 = vmov 0.0  }
  0x4e   :  { %1287 = vmatpush3.bf16.msra.mxu0 %v1286_v7  ;;  %v1290_v13 = vpack.c.bf16 %v95_v10, %v94_v9  ;;  %v1292_v14 = vpack.c.bf16 %v113_v12, %v112_v11  ;;  %v97_v16 = vld [vmem:[#allocation5 + $0x28] sm:$0xff]  ;;  %v114_v17 = vld [vmem:[#allocation5 + $0xb0] sm:$0xff]  ;;  %v115_v18 = vld [vmem:[#allocation5 + $0xb8] sm:$0xff]  ;;  %1152 = vmatprep.mubr.f32.mxu1 %v2316_v3 }
  0x4f   :  { %1289 = vmatprep.subr.bf16.mxu0 %v1288_v8  ;;  %v1294_v19 = vpack.c.bf16 %v97_v16, %v96_v15  ;;  %v1296_v20 = vpack.c.bf16 %v115_v18, %v114_v17  ;;  %v98_v21 = vld [vmem:[#allocation5 + $0x30] sm:$0xff]  ;;  %v99_v22 = vld [vmem:[#allocation5 + $0x38] sm:$0xff]  ;;  %v116_v23 = vld [vmem:[#allocation5 + $0xc0] sm:$0xff] }
  0x50   :  { %v117_v24 = vld [vmem:[#allocation5 + $0xc8] sm:$0xff]  ;;  %v86_v25 = vld [vmem:[#allocation2 + $0x30] sm:$0xff]  ;;  %v1298_v26 = vpack.c.bf16 %v99_v22, %v98_v21  ;;  %v100_v28 = vld [vmem:[#allocation5 + $0x40] sm:$0xff] }
  0x51   :  { %188 = vmatprep.mubr.f32.mxu0 %v86_v25  ;;  %v1300_v27 = vpack.c.bf16 %v117_v24, %v116_v23  ;;  %v101_v29 = vld [vmem:[#allocation5 + $0x48] sm:$0xff]  ;;  %v118_v30 = vld [vmem:[#allocation5 + $0xd0] sm:$0xff]  ;;  %v119_v31 = vld [vmem:[#allocation5 + $0xd8] sm:$0xff] }
  0x52   :  { %1291 = vmatpush3.bf16.msra.mxu0 %v1290_v13  ;;  %v1302_v32 = vpack.c.bf16 %v101_v29, %v100_v28  ;;  %v1304_v33 = vpack.c.bf16 %v119_v31, %v118_v30  ;;  %v102_v34 = vld [vmem:[#allocation5 + $0x50] sm:$0xff]  ;;  %v103_v35 = vld [vmem:[#allocation5 + $0x58] sm:$0xff]  ;;  %v120_v36 = vld [vmem:[#allocation5 + $0xe0] sm:$0xff] }
  0x53   :  { %1293 = vmatprep.subr.bf16.mxu0 %v1292_v14  ;;  %v121_v37 = vld [vmem:[#allocation5 + $0xe8] sm:$0xff]  ;;  %v1306_v38 = vpack.c.bf16 %v103_v35, %v102_v34  ;;  %v104_v40 = vld [vmem:[#allocation5 + $0x60] sm:$0xff]  ;;  %v122_v42 = vld [vmem:[#allocation5 + $0xf0] sm:$0xff] }
  0x54   :  { %v1308_v39 = vpack.c.bf16 %v121_v37, %v120_v36  ;;  %v105_v41 = vld [vmem:[#allocation5 + $0x68] sm:$0xff]  ;;  %v123_v43 = vld [vmem:[#allocation5 + $0xf8] sm:$0xff]  ;;  %v106_v46 = vld [vmem:[#allocation5 + $0x70] sm:$0xff] }
  0x55   :  { %v1310_v44 = vpack.c.bf16 %v105_v41, %v104_v40  ;;  %v1312_v45 = vpack.c.bf16 %v123_v43, %v122_v42  ;;  %v107_v47 = vld [vmem:[#allocation5 + $0x78] sm:$0xff]  ;;  %v79_v49 = vld [vmem:[#allocation2] sm:$0xff]  ;;  %v80_v51 = vld [vmem:[#allocation2 + $0x8] sm:$0xff] }
  0x56   :  { %1295 = vmatpush3.bf16.msra.mxu0 %v1294_v19  ;;  %v1314_v48 = vpack.c.bf16 %v107_v47, %v106_v46  ;;  %v87_v50 = vld [vmem:[#allocation2 + $0x38] sm:$0xff]  ;;  %v88_v52 = vld [vmem:[#allocation2 + $0x40] sm:$0xff]  ;;  %v81_v53 = vld [vmem:[#allocation2 + $0x10] sm:$0xff] }
  0x57   :  { %1297 = vmatprep.subr.bf16.mxu0 %v1296_v20  ;;  %v89_v54 = vld [vmem:[#allocation2 + $0x48] sm:$0xff]  ;;  %v82_v55 = vld [vmem:[#allocation2 + $0x18] sm:$0xff]  ;;  %v90_v56 = vld [vmem:[#allocation2 + $0x50] sm:$0xff] }
  0x58   :  { %v83_v57 = vld [vmem:[#allocation2 + $0x20] sm:$0xff]  ;;  %v91_v58 = vld [vmem:[#allocation2 + $0x58] sm:$0xff]  ;;  %v84_v59 = vld [vmem:[#allocation2 + $0x28] sm:$0xff] }
  0x59   :  { %v1045_v60 = vld [vmem:[#allocation8 + $0x8] sm:$0xff]  ;;  %v1047_v61 = vld [vmem:[#allocation8 + $0x18] sm:$0xff]  ;;  %v1044_v62 = vld [vmem:[#allocation8] sm:$0xff] }
  0x5a   :  { %1299 = vmatpush3.bf16.msra.mxu0 %v1298_v26  ;;  %v1316_v63 = vpack.c.bf16 %v1047_v61, %v1045_v60  ;;  %v1046_v0 = vld [vmem:[#allocation8 + $0x10] sm:$0xff]  ;;  %v1049_v1 = vld [vmem:[#allocation8 + $0x28] sm:$0xff]  ;;  %v1051_v2 = vld [vmem:[#allocation8 + $0x38] sm:$0xff] }
  0x5b   :  { %1301 = vmatprep.subr.bf16.mxu0 %v1300_v27  ;;  %v1318_v4 = vpack.c.bf16 %v1046_v0, %v1044_v62  ;;  %v1320_v5 = vpack.c.bf16 %v1051_v2, %v1049_v1  ;;  %v1048_v6 = vld [vmem:[#allocation8 + $0x20] sm:$0xff]  ;;  %v1050_v7 = vld [vmem:[#allocation8 + $0x30] sm:$0xff]  ;;  %v1053_v8 = vld [vmem:[#allocation8 + $0x48] sm:$0xff] }
  0x5c   :  { %1317 = vmatprep.subr.bf16.mxu1 %v1316_v63  ;;  %v1055_v9 = vld [vmem:[#allocation8 + $0x58] sm:$0xff]  ;;  %v1322_v10 = vpack.c.bf16 %v1050_v7, %v1048_v6  ;;  %v1052_v12 = vld [vmem:[#allocation8 + $0x40] sm:$0xff]  ;;  %v1054_v13 = vld [vmem:[#allocation8 + $0x50] sm:$0xff] }
  0x5d   :  { %1319 = vmatpush1.bf16.msra.mxu1 %v1318_v4  ;;  %v1324_v11 = vpack.c.bf16 %v1055_v9, %v1053_v8  ;;  %v1057_v14 = vld [vmem:[#allocation8 + $0x68] sm:$0xff]  ;;  %v1059_v15 = vld [vmem:[#allocation8 + $0x78] sm:$0xff]  ;;  %v1326_v16 = vpack.c.bf16 %v1054_v13, %v1052_v12  ;;  %v1056_v18 = vld [vmem:[#allocation8 + $0x60] sm:$0xff] }
  0x5e   :  { %1303 = vmatpush3.bf16.msra.mxu0 %v1302_v32  ;;  %1321 = vmatprep.subr.bf16.mxu1 %v1320_v5  ;;  %v1328_v17 = vpack.c.bf16 %v1059_v15, %v1057_v14  ;;  %v1058_v19 = vld [vmem:[#allocation8 + $0x70] sm:$0xff]  ;;  %v1061_v20 = vld [vmem:[#allocation8 + $0x88] sm:$0xff]  ;;  %v1063_v21 = vld [vmem:[#allocation8 + $0x98] sm:$0xff] }
  0x5f   :  { %1305 = vmatprep.subr.bf16.mxu0 %v1304_v33  ;;  %v1330_v22 = vpack.c.bf16 %v1058_v19, %v1056_v18  ;;  %v1332_v23 = vpack.c.bf16 %v1063_v21, %v1061_v20  ;;  %v1060_v24 = vld [vmem:[#allocation8 + $0x80] sm:$0xff]  ;;  %v1062_v25 = vld [vmem:[#allocation8 + $0x90] sm:$0xff]  ;;  %v1065_v26 = vld [vmem:[#allocation8 + $0xa8] sm:$0xff] }
  0x60   :  { %v1067_v27 = vld [vmem:[#allocation8 + $0xb8] sm:$0xff]  ;;  %v1334_v28 = vpack.c.bf16 %v1062_v25, %v1060_v24  ;;  %v1064_v30 = vld [vmem:[#allocation8 + $0xa0] sm:$0xff]  ;;  %v1066_v31 = vld [vmem:[#allocation8 + $0xb0] sm:$0xff] }
  0x61   :  { %1323 = vmatpush1.bf16.msra.mxu1 %v1322_v10  ;;  %v1336_v29 = vpack.c.bf16 %v1067_v27, %v1065_v26  ;;  %v1069_v32 = vld [vmem:[#allocation8 + $0xc8] sm:$0xff]  ;;  %v1071_v33 = vld [vmem:[#allocation8 + $0xd8] sm:$0xff]  ;;  %v1338_v34 = vpack.c.bf16 %v1066_v31, %v1064_v30  ;;  %v1068_v36 = vld [vmem:[#allocation8 + $0xc0] sm:$0xff] }
  0x62   :  { %1307 = vmatpush3.bf16.msra.mxu0 %v1306_v38  ;;  %1325 = vmatprep.subr.bf16.mxu1 %v1324_v11  ;;  %v1340_v35 = vpack.c.bf16 %v1071_v33, %v1069_v32  ;;  %v1070_v37 = vld [vmem:[#allocation8 + $0xd0] sm:$0xff]  ;;  %v1073_v38 = vld [vmem:[#allocation8 + $0xe8] sm:$0xff]  ;;  %v1072_v42 = vld [vmem:[#allocation8 + $0xe0] sm:$0xff] }
  0x63   :  { %1309 = vmatprep.subr.bf16.mxu0 %v1308_v39  ;;  %v1075_v39 = vld [vmem:[#allocation8 + $0xf8] sm:$0xff]  ;;  %v1342_v40 = vpack.c.bf16 %v1070_v37, %v1068_v36  ;;  %v1074_v43 = vld [vmem:[#allocation8 + $0xf0] sm:$0xff] }
  0x64   :  { %v1344_v41 = vpack.c.bf16 %v1075_v39, %v1073_v38 }
  0x65   :  { %1327 = vmatpush1.bf16.msra.mxu1 %v1326_v16 }
  0x66   :  { %1311 = vmatpush3.bf16.msra.mxu0 %v1310_v44  ;;  %1329 = vmatprep.subr.bf16.mxu1 %v1328_v17  ;;  %v1346_v44 = vpack.c.bf16 %v1074_v43, %v1072_v42 }
  0x67   :  { %1313 = vmatprep.subr.bf16.mxu0 %v1312_v45  ;;  %v222_v45 = vlaneseq }
  0x69   :  { %1331 = vmatpush1.bf16.msra.mxu1 %v1330_v22  ;;  %v1593_v46 = vshrl.u32 %v222_v45, 7 }
  0x6a   :  { %1315 = vmatpush3.bf16.msra.mxu0 %v1314_v48  ;;  %1333 = vmatprep.subr.bf16.mxu1 %v1332_v23  ;;  %v219_v48 = vld [vmem:[#allocation7] sm:$0xff] }
  0x6b   :  { %v1596_v47 = vsub.s32 0, %v1593_v46  ;;  %vm2337_vm0 = vcmp.lt.s32.totalorder %v1593_v46, 1  ;;  %vm2339_vm1 = vcmp.lt.s32.totalorder %v1593_v46, 2  ;;  %vm2340_vm2 = vcmp.lt.s32.totalorder %v1593_v46, 3 }
  0x6c   :  { %v226_v5 = vadd.s32 24, %v1593_v46  ;;  %vm482_vm3 = vcmp.lt.s32.totalorder %v1593_v46, 4  ;;  %vm535_vm4 = vcmp.lt.s32.totalorder %v1593_v46, 5  ;;  %vm588_vm5 = vcmp.lt.s32.totalorder %v1593_v46, 6 }
  0x6d   :  { %189 = vmatmul.mubr.f32.vlgmr.msra.gmra.mrb[0].mxu0 %v79_v49  ;;  %1335 = vmatpush1.bf16.msra.mxu1 %v1334_v28  ;;  %2352 = vst [vmem:[#allocation15_spill] sm:$0xff] %v1596_v47  ;;  %v220_v49 = vld [vmem:[#allocation7 + $0x8] sm:$0xff]  ;;  %vm2325_vm6 = vcmp.lt.s32.totalorder %v1593_v46, 7  ;;  %v227_v15 = vadd.s32 32, %v1593_v46  ;;  %v1657_v17 = vand.u32 15, %v1593_v46 }
  0x6e   :  { %193 = vmatprep.mubr.f32.mxu0 %v87_v50  ;;  %1337 = vmatprep.subr.bf16.mxu1 %v1336_v29  ;;  %v1599_v50 = vsub.s32 1, %v1593_v46  ;;  %v1613_v60 = vrot.slane %v220_v49, %v1596_v47  ;;  %v1672_v23 = vand.u32 15, %v226_v5  ;;  %v1740_v5 = vld [vmem:[%s2312_s3] ss:$0 sm:$0xff] }
  0x6f   :  { %v1694_v33 = vand.u32 15, %v227_v15  ;;  %vm311_vm13 = vcmp.ge.s32.totalorder %v1657_v17, 1  ;;  %vm364_vm14 = vcmp.ge.s32.totalorder %v1657_v17, 2  ;;  %vm629_vm15 = vcmp.ge.s32.totalorder %v1657_v17, 7 }
  0x70   :  { %2353 = vst [vmem:[#allocation16_spill] sm:$0xff] %v1599_v50  ;;  %v1616_v61 = vrot.slane %v219_v48, %v1599_v50  ;;  %v1638_v8 = vrot.slane %v220_v49, %v1599_v50  ;;  %v1664_v20 = vmul.f32 0.0, %v1613_v60 }
  0x71   :  { %194 = vmatmul.mubr.f32.gmra.mrb[2].mxu0 %v80_v51  ;;  %1339 = vmatpush1.bf16.msra.mxu1 %v1338_v34  ;;  %v403_v51 = vsub.s32 2, %v1593_v46 }
  0x72   :  { %198 = vmatprep.mubr.f32.mxu0 %v88_v52  ;;  %1341 = vmatprep.subr.bf16.mxu1 %v1340_v35  ;;  %v456_v52 = vsub.s32 3, %v1593_v46  ;;  %v1667_v21 = vmul.f32 0.0, %v1638_v8 }
  0x73   :  { %v1618_v62 = vrot.slane %v219_v48, %v403_v51  ;;  %v1640_v9 = vrot.slane %v220_v49, %v403_v51 }
  0x74   :  { %v1620_v63 = vrot.slane %v219_v48, %v456_v52  ;;  %v1647_v12 = vrot.slane %v220_v49, %v456_v52 }
  0x75   :  { %199 = vmatmul.mubr.f32.gmra.mrb[4].mxu0 %v81_v53  ;;  %1343 = vmatpush1.bf16.msra.mxu1 %v1342_v40  ;;  %v509_v53 = vsub.s32 4, %v1593_v46  ;;  %v1670_v22 = vmul.f32 0.0, %v1640_v9 }
  0x76   :  { %203 = vmatprep.mubr.f32.mxu0 %v89_v54  ;;  %1345 = vmatprep.subr.bf16.mxu1 %v1344_v41  ;;  %v224_v54 = vadd.s32 8, %v1593_v46  ;;  %v1675_v25 = vmul.f32 0.0, %v1647_v12 }
  0x77   :  { %v1622_v0 = vrot.slane %v219_v48, %v509_v53  ;;  %v1649_v13 = vrot.slane %v220_v49, %v509_v53 }
  0x78   :  { %v1624_v1 = vand.u32 15, %v224_v54 }
  0x79   :  { %204 = vmatmul.mubr.f32.gmra.mrb[6].mxu0 %v82_v55  ;;  %1347 = vmatpush1.bf16.msra.mxu1 %v1346_v44  ;;  %v562_v55 = vsub.s32 5, %v1593_v46  ;;  %v1678_v26 = vmul.f32 0.0, %v1649_v13 }
  0x7a   :  { %208 = vmatprep.mubr.f32.mxu0 %v90_v56  ;;  %v615_v56 = vsub.s32 6, %v1593_v46 }
  0x7b   :  { %v1629_v2 = vrot.slane %v219_v48, %v562_v55  ;;  %v1651_v14 = vrot.slane %v220_v49, %v562_v55 }
  0x7c   :  { %v1631_v4 = vrot.slane %v219_v48, %v615_v56  ;;  %v1659_v18 = vrot.slane %v220_v49, %v615_v56 }
  0x7d   :  { %209 = vmatmul.mubr.f32.gmra.mrb[8].mxu0 %v83_v57  ;;  %v668_v57 = vsub.s32 7, %v1593_v46  ;;  %v1681_v27 = vmul.f32 0.0, %v1651_v14 }
  0x7e   :  { %213 = vmatprep.mubr.f32.mxu0 %v91_v58  ;;  %v225_v58 = vadd.s32 16, %v1593_v46  ;;  %v1684_v28 = vmul.f32 0.0, %v1659_v18 }
  0x7f   :  { %v1635_v7 = vrot.slane %v219_v48, %v668_v57  ;;  %v1661_v19 = vrot.slane %v220_v49, %v668_v57 }
  0x80   :  { %v1642_v10 = vand.u32 15, %v225_v58  ;;  %2354 = vst [vmem:[#allocation17_spill] sm:$0xff] %v1684_v28 }
  0x81   :  { %214 = vmatmul.mubr.f32.gmra.mrb[10].mxu0 %v84_v59  ;;  %v1610_v59 = vrot.slane %v219_v48, %v1596_v47  ;;  %v1692_v32 = vmul.f32 0.0, %v1661_v19 }
  0x82   :  { %vm313_vm7 = vcmp.ge.s32.totalorder %v1642_v10, 1  ;;  %vm366_vm8 = vcmp.ge.s32.totalorder %v1642_v10, 2  ;;  %vm419_vm9 = vcmp.ge.s32.totalorder %v1642_v10, 3  ;;  %vm472_vm10 = vcmp.ge.s32.totalorder %v1642_v10, 4 }
  0x83   :  { %2355 = vst [vmem:[#allocation18_spill] sm:$0xff] %v1692_v32  ;;  %vm525_vm11 = vcmp.ge.s32.totalorder %v1642_v10, 5  ;;  %vm578_vm12 = vcmp.ge.s32.totalorder %v1642_v10, 6 }
 0x140   :  { %v1266_v6 = vpop.f32.mrb[0].mxu0 }
 0x141   :  { %v1267_v11 = vpop.f32.mrb[1].mxu0 }
 0x142   :  { %v1654_v16 = vadd.f32 %v1267_v11, %v1266_v6 }
 0x144   :  { %v1269_v24 = vpop.f32.mrb[2].mxu0  ;;  %v1688_v30 = vmul.f32 %v1654_v16, %v1610_v59  ;;  %v2323_v31 = vrot.slane %v1654_v16, 7  ;;  %v2322_v35 = vrot.slane %v1654_v16, 6  ;;  %v2320_v36 = vrot.slane %v1654_v16, 5 }
 0x145   :  { %v1270_v29 = vpop.f32.mrb[3].mxu0  ;;  %v2319_v37 = vrot.slane %v1654_v16, 4  ;;  %v2318_v38 = vrot.slane %v1654_v16, 3  ;;  %v2321_v39 = vrot.slane %v1654_v16, 2  ;;  %v2324_v40 = vrot.slane %v1654_v16, 1 }
 0x146   :  { %v1696_v34 = vadd.f32 %v1270_v29, %v1269_v24  ;;  %v1707_v41 = vmul.f32 %v1654_v16, %v1613_v60 }
 0x148   :  { %v1272_v42 = vpop.f32.mrb[4].mxu0  ;;  %v306_v43 = vmul.f32 %v1696_v34, %v1610_v59  ;;  %v318_v44 = vrot.slane %v1696_v34, 7  ;;  %v371_v45 = vrot.slane %v1696_v34, 6  ;;  %v424_v48 = vrot.slane %v1696_v34, 5 }
 0x149   :  { %v1273_v49 = vpop.f32.mrb[5].mxu0  ;;  %v477_v51 = vrot.slane %v1696_v34, 4  ;;  %v2328_v52 = vrot.slane %v1696_v34, 3  ;;  %v2327_v53 = vrot.slane %v1696_v34, 2  ;;  %v2326_v54 = vrot.slane %v1696_v34, 1 }
 0x14a   :  { %v1721_v55 = vadd.f32 %v1273_v49, %v1272_v42  ;;  %v328_v56 = vsel %vm2337_vm0, %v2323_v31, %v318_v44  ;;  %v381_v57 = vsel %vm2339_vm1, %v2322_v35, %v371_v45  ;;  %v434_v58 = vsel %vm2340_vm2, %v2320_v36, %v424_v48 }
 0x14b   :  { %v353_v6 = vmul.f32 %v1616_v61, %v328_v56  ;;  %v406_v11 = vmul.f32 %v1618_v62, %v381_v57  ;;  %v459_v15 = vmul.f32 %v1620_v63, %v434_v58  ;;  %v487_v24 = vsel %vm482_vm3, %v2319_v37, %v477_v51 }
 0x14c   :  { %v1275_v29 = vpop.f32.mrb[6].mxu0  ;;  %v512_v42 = vmul.f32 %v1622_v0, %v487_v24  ;;  %v540_v49 = vsel %vm535_vm4, %v2318_v38, %v2328_v52  ;;  %v593_v56 = vsel %vm588_vm5, %v2321_v39, %v2327_v53  ;;  %v646_v57 = vsel %vm2325_vm6, %v2324_v40, %v2326_v54 }
 0x14d   :  { %v1276_v58 = vpop.f32.mrb[7].mxu0  ;;  %v359_v24 = vadd.f32 %v353_v6, %v306_v43  ;;  %v565_v3 = vmul.f32 %v1629_v2, %v540_v49  ;;  %v618_v38 = vmul.f32 %v1631_v4, %v593_v56  ;;  %v1771_v37 = vmul.f32 %v1635_v7, %v646_v57 }
 0x14e   :  { %v1773_v36 = vadd.f32 %v1276_v58, %v1275_v29  ;;  %v1776_v39 = vmul.f32 %v1740_v5, %v646_v57  ;;  %v307_v35 = vmul.f32 %v1721_v55, %v1610_v59  ;;  %v2329_v31 = vrot.slane %v1721_v55, 7 }
 0x14f   :  { %v412_v40 = vadd.f32 %v406_v11, %v359_v24  ;;  %v2332_v43 = vrot.slane %v1721_v55, 6  ;;  %v2331_v6 = vrot.slane %v1721_v55, 5  ;;  %v2330_v49 = vrot.slane %v1721_v55, 4 }
 0x150   :  { %2356 = vst [vmem:[#allocation19_spill] sm:$0xff] %v1776_v39  ;;  %v1278_v56 = vpop.f32.mrb[8].mxu0  ;;  %v1792_v11 = vsel %vm2337_vm0, %v318_v44, %v2329_v31  ;;  %v2333_v29 = vrot.slane %v1721_v55, 3  ;;  %v2335_v57 = vrot.slane %v1721_v55, 2  ;;  %vm576_vm6 = vcmp.ge.s32.totalorder %v1657_v17, 6 }
 0x151   :  { %v1279_v24 = vpop.f32.mrb[9].mxu0  ;;  %v465_v54 = vadd.f32 %v459_v15, %v412_v40  ;;  %v344_v53 = vsel %vm313_vm7, %v1792_v11, 0.0  ;;  %v1804_v52 = vsel %vm2339_vm1, %v371_v45, %v2332_v43  ;;  %v1810_v44 = vsel %vm2340_vm2, %v424_v48, %v2331_v6 }
 0x152   :  { %2357 = vst [vmem:[#allocation20_spill] sm:$0xff] %v1804_v52  ;;  %2358 = vst [vmem:[#allocation21_spill] sm:$0xff] %v1810_v44  ;;  %v1812_v31 = vadd.f32 %v1279_v24, %v1278_v56  ;;  %v354_v40 = vmul.f32 %v1616_v61, %v344_v53  ;;  %v397_v15 = vsel %vm366_vm8, %v1804_v52, 0.0  ;;  %v450_v58 = vsel %vm419_vm9, %v1810_v44, 0.0 }
 0x153   :  { %v518_v45 = vadd.f32 %v512_v42, %v465_v54  ;;  %vm523_vm7 = vcmp.ge.s32.totalorder %v1657_v17, 5  ;;  %v407_v48 = vmul.f32 %v1618_v62, %v397_v15  ;;  %v1826_v56 = vmul.f32 %v1620_v63, %v450_v58 }
 0x154   :  { %v1832_v53 = vsel %vm482_vm3, %v477_v51, %v2330_v49  ;;  %v1281_v24 = vpop.f32.mrb[10].mxu0  ;;  %v360_v54 = vadd.f32 %v354_v40, %v307_v35  ;;  %v2360_v15 = vrot.slane %v1696_v34, 3  ;;  %v2362_v51 = vrot.slane %v1696_v34, 2 }
 0x155   :  { %2359 = vst [vmem:[#allocation22_spill] sm:$0xff] %v1832_v53  ;;  %v503_v42 = vsel %vm472_vm10, %v1832_v53, 0.0  ;;  %v1282_v35 = vpop.f32.mrb[11].mxu0  ;;  %v571_v40 = vadd.f32 %v565_v3, %v518_v45  ;;  %vm631_vm9 = vcmp.ge.s32.totalorder %v1642_v10, 7  ;;  %vm763_vm10 = vcmp.ge.s32.totalorder %v1624_v1, 10 }
 0x156   :  { %v1844_v58 = vsel %vm535_vm4, %v2360_v15, %v2333_v29  ;;  %v1852_v49 = vsel %vm588_vm5, %v2362_v51, %v2335_v57  ;;  %v513_v6 = vmul.f32 %v1622_v0, %v503_v42  ;;  %v1862_v29 = vadd.f32 %v1282_v35, %v1281_v24 }
 0x157   :  { %2361 = vst [vmem:[#allocation23_spill] sm:$0xff] %v1844_v58  ;;  %2363 = vst [vmem:[#allocation24_spill] sm:$0xff] %v1852_v49  ;;  %v556_v43 = vsel %vm525_vm11, %v1844_v58, 0.0  ;;  %v609_v15 = vsel %vm578_vm12, %v1852_v49, 0.0  ;;  %v413_v50 = vadd.f32 %v407_v48, %v360_v54  ;;  %v624_v3 = vadd.f32 %v618_v38, %v571_v40 }
 0x158   :  { %2364 = vst [vmem:[#allocation25_spill] sm:$0xff] %v1862_v29  ;;  %v566_v51 = vmul.f32 %v1629_v2, %v556_v43  ;;  %v1866_v57 = vmul.f32 %v1631_v4, %v609_v15  ;;  %v2365_v45 = vrot.slane %v1721_v55, 1  ;;  %v2366_v42 = vrot.slane %v1696_v34, 1 }
 0x159   :  { %vm2367_vm12 = vcmp.lt.s32.totalorder %v1593_v46, 7  ;;  %v1881_v43 = vmul.f32 %v1773_v36, %v1610_v59  ;;  %v2341_v35 = vrot.slane %v1862_v29, 7  ;;  %v2338_v38 = vrot.slane %v1862_v29, 6 }
 0x15a   :  { %v1877_v24 = vsel %vm2367_vm12, %v2366_v42, %v2365_v45  ;;  %vm883_vm11 = vcmp.ge.s32.totalorder %v1624_v1, 13  ;;  %vm923_vm8 = vcmp.ge.s32.totalorder %v1624_v1, 14  ;;  %v677_v42 = vadd.f32 %v1771_v37, %v624_v3 }
 0x15b   :  { %v2368_v48 = vrot.slane %v1654_v16, 7  ;;  %v2369_v40 = vrot.slane %v1654_v16, 6  ;;  %v2370_v15 = vrot.slane %v1654_v16, 5  ;;  %v2371_v45 = vrot.slane %v1862_v29, 5 }
 0x15c   :  { %v2372_v3 = vrot.slane %v1654_v16, 4  ;;  %v2373_v47 = vrot.slane %v1862_v29, 4  ;;  %vm963_vm12 = vcmp.ge.s32.totalorder %v1624_v1, 15  ;;  %v2376_v58 = vrot.slane %v1654_v16, 3 }
 0x15d   :  { %v329_v54 = vsel %vm2337_vm0, %v2341_v35, %v2368_v48  ;;  %v382_v34 = vsel %vm2339_vm1, %v2338_v38, %v2369_v40  ;;  %v435_v37 = vsel %vm2340_vm2, %v2371_v45, %v2370_v15  ;;  %vm1003_vm0 = vcmp.lt.s32.totalorder %v1624_v1, 15 }
 0x15e   :  { %v488_v48 = vsel %vm482_vm3, %v2373_v47, %v2372_v3  ;;  %v342_v40 = vsel %vm311_vm13, %v329_v54, 0.0  ;;  %v395_v38 = vsel %vm364_vm14, %v382_v34, 0.0  ;;  %vm2374_vm1 = vcmp.ge.s32.totalorder %v1657_v17, 3 }
 0x15f   :  { %v448_v15 = vsel %vm2374_vm1, %v435_v37, 0.0  ;;  %vm2375_vm2 = vcmp.ge.s32.totalorder %v1657_v17, 4  ;;  %v352_v35 = vmul.f32 %v1616_v61, %v342_v40  ;;  %v405_v47 = vmul.f32 %v1618_v62, %v395_v38 }
 0x160   :  { %v501_v45 = vsel %vm2375_vm2, %v488_v48, 0.0  ;;  %v458_v3 = vmul.f32 %v1620_v63, %v448_v15  ;;  %v2377_v53 = vrot.slane %v1862_v29, 3  ;;  %v2378_v39 = vrot.slane %v1654_v16, 2 }
 0x161   :  { %v511_v49 = vmul.f32 %v1622_v0, %v501_v45  ;;  %v2379_v52 = vrot.slane %v1862_v29, 2  ;;  %v2380_v38 = vrot.slane %v1654_v16, 1  ;;  %v2381_v15 = vrot.slane %v1862_v29, 1 }
 0x162   :  { %v541_v44 = vsel %vm535_vm4, %v2377_v53, %v2376_v58  ;;  %vm2382_vm1 = vcmp.lt.s32.totalorder %v1593_v46, 7  ;;  %v717_v32 = vadd.f32 %v1707_v41, %v677_v42  ;;  %v358_v28 = vadd.f32 %v352_v35, %v1688_v30 }
 0x163   :  { %v594_v40 = vsel %vm588_vm5, %v2379_v52, %v2378_v39  ;;  %v1950_v45 = vsel %vm2382_vm1, %v2381_v15, %v2380_v38  ;;  %v554_v53 = vsel %vm523_vm7, %v541_v44, 0.0  ;;  %vm2383_vm2 = vcmp.ge.s32.totalorder %v1624_v1, 9 }
 0x164   :  { %v607_v58 = vsel %vm576_vm6, %v594_v40, 0.0  ;;  %v660_v16 = vsel %vm629_vm15, %v1950_v45, 0.0  ;;  %v564_v39 = vmul.f32 %v1629_v2, %v554_v53  ;;  %v741_v41 = vsel %vm2383_vm2, %v329_v54, 0.0 }
 0x165   :  { %v617_v52 = vmul.f32 %v1631_v4, %v607_v58  ;;  %v670_v38 = vmul.f32 %v1635_v7, %v660_v16  ;;  %v411_v30 = vadd.f32 %v405_v47, %v358_v28  ;;  %v751_v35 = vmul.f32 %v1638_v8, %v741_v41 }
 0x166   :  { %v466_v42 = vadd.f32 %v1826_v56, %v413_v50  ;;  %v662_v15 = vsel %vm631_vm9, %v1877_v24, 0.0  ;;  %v781_v53 = vsel %vm763_vm10, %v382_v34, 0.0  ;;  %vm2384_vm6 = vcmp.ge.s32.totalorder %v1624_v1, 11 }
 0x167   :  { %v672_v17 = vmul.f32 %v1635_v7, %v662_v15  ;;  %v821_v58 = vsel %vm2384_vm6, %v435_v37, 0.0  ;;  %vm2385_vm13 = vcmp.ge.s32.totalorder %v1624_v1, 12  ;;  %v464_v28 = vadd.f32 %v458_v3, %v411_v30 }
 0x168   :  { %v861_v54 = vsel %vm2385_vm13, %v488_v48, 0.0  ;;  %v757_v47 = vadd.f32 %v751_v35, %v717_v32  ;;  %v519_v16 = vadd.f32 %v513_v6, %v466_v42  ;;  %v791_v50 = vmul.f32 %v1640_v9, %v781_v53 }
 0x169   :  { %v831_v56 = vmul.f32 %v1647_v12, %v821_v58  ;;  %v871_v10 = vmul.f32 %v1649_v13, %v861_v54  ;;  %v901_v41 = vsel %vm883_vm11, %v541_v44, 0.0  ;;  %v941_v34 = vsel %vm923_vm8, %v594_v40, 0.0 }
 0x16a   :  { %v517_v15 = vadd.f32 %v511_v49, %v464_v28  ;;  %v572_v37 = vadd.f32 %v566_v51, %v519_v16  ;;  %v797_v29 = vadd.f32 %v791_v50, %v757_v47  ;;  %v911_v48 = vmul.f32 %v1651_v14, %v901_v41 }
 0x16b   :  { %vm725_vm14 = vcmp.ge.s32.totalorder %v1672_v23, 9  ;;  %v951_v32 = vmul.f32 %v1659_v18, %v941_v34  ;;  %v981_v6 = vsel %vm963_vm12, %v1950_v45, 0.0  ;;  %v1021_v44 = vsel %vm1003_vm0, %v1877_v24, 0.0 }
 0x16c   :  { %v2386_v3 = vrot.slane %v1773_v36, 7  ;;  %v2387_v49 = vrot.slane %v1721_v55, 7  ;;  %vm2388_vm15 = vcmp.lt.s32.totalorder %v1593_v46, 1  ;;  %v570_v40 = vadd.f32 %v564_v39, %v517_v15 }
 0x16d   :  { %v625_v30 = vadd.f32 %v1866_v57, %v572_v37  ;;  %v837_v35 = vadd.f32 %v831_v56, %v797_v29  ;;  %v991_v42 = vmul.f32 %v1661_v19, %v981_v6  ;;  %v1033_v53 = vmul.f32 %v1740_v5, %v1021_v44 }
 0x16e   :  { %v326_v51 = vsel %vm2388_vm15, %v2387_v49, %v2386_v3  ;;  %v373_v1 = vrot.slane %v1773_v36, 6  ;;  %v426_v54 = vrot.slane %v1773_v36, 5  ;;  %v623_v28 = vadd.f32 %v617_v52, %v570_v40 }
 0x16f   :  { %v355_v58 = vmul.f32 %v1616_v61, %v326_v51  ;;  %v678_v47 = vadd.f32 %v672_v17, %v625_v30  ;;  %v877_v16 = vadd.f32 %v871_v10, %v837_v35  ;;  %v479_v50 = vrot.slane %v1773_v36, 4 }
 0x170   :  { %v2389_v29 = vrot.slane %v1721_v55, 6  ;;  %vm2390_vm0 = vcmp.lt.s32.totalorder %v1593_v46, 2  ;;  %v2391_v56 = vrot.slane %v1721_v55, 5  ;;  %vm2392_vm7 = vcmp.lt.s32.totalorder %v1593_v46, 3 }
 0x171   :  { %v361_v39 = vadd.f32 %v355_v58, %v1881_v43  ;;  %v532_v17 = vrot.slane %v1773_v36, 3  ;;  %vm315_vm8 = vcmp.ge.s32.totalorder %v1694_v33, 1  ;;  %v676_v10 = vadd.f32 %v670_v38, %v623_v28 }
 0x172   :  { %v379_v57 = vsel %vm2390_vm0, %v2389_v29, %v373_v1  ;;  %v432_v52 = vsel %vm2392_vm7, %v2391_v56, %v426_v54  ;;  %v718_v43 = vadd.f32 %v1664_v20, %v678_v47  ;;  %v917_v41 = vadd.f32 %v911_v48, %v877_v16 }
 0x173   :  { %v408_v34 = vmul.f32 %v1618_v62, %v379_v57  ;;  %vm368_vm9 = vcmp.ge.s32.totalorder %v1694_v33, 2  ;;  %v461_v15 = vmul.f32 %v1620_v63, %v432_v52  ;;  %v2393_v37 = vrot.slane %v1721_v55, 4 }
 0x174   :  { %v2394_v38 = vrot.slane %v1721_v55, 3  ;;  %v585_v44 = vrot.slane %v1773_v36, 2  ;;  %vm421_vm10 = vcmp.ge.s32.totalorder %v1694_v33, 3  ;;  %v716_v3 = vadd.f32 %v1664_v20, %v676_v10 }
 0x175   :  { %v485_v6 = vsel %vm482_vm3, %v2393_v37, %v479_v50  ;;  %v957_v49 = vadd.f32 %v951_v32, %v917_v41  ;;  %v414_v51 = vadd.f32 %v408_v34, %v361_v39  ;;  %v2395_v35 = vrot.slane %v1721_v55, 2 }
 0x176   :  { %v538_v48 = vsel %vm535_vm4, %v2394_v38, %v532_v17  ;;  %v514_v40 = vmul.f32 %v1622_v0, %v485_v6  ;;  %v638_v28 = vrot.slane %v1773_v36, 1  ;;  %v713_v47 = vmul.f32 %v1721_v55, %v1613_v60 }
 0x177   :  { %v567_v30 = vmul.f32 %v1629_v2, %v538_v48  ;;  %v591_v58 = vsel %vm588_vm5, %v2395_v35, %v585_v44  ;;  %vm474_vm11 = vcmp.ge.s32.totalorder %v1694_v33, 4  ;;  %v756_v32 = vadd.f32 %v1667_v21, %v716_v3 }
 0x178   :  { %v997_v16 = vadd.f32 %v991_v42, %v957_v49  ;;  %v467_v39 = vadd.f32 %v461_v15, %v414_v51  ;;  %v620_v29 = vmul.f32 %v1631_v4, %v591_v58  ;;  %vm527_vm12 = vcmp.ge.s32.totalorder %v1694_v33, 5 }
 0x179   :  { %v2396_v57 = vrot.slane %v1721_v55, 1  ;;  %v743_v52 = vsel %vm725_vm14, %v1792_v11, 0.0  ;;  %v758_v10 = vadd.f32 %v1667_v21, %v718_v43  ;;  %v309_v42 = vmul.f32 %v1812_v31, %v1610_v59  ;;  %vm2398_vm14 = vmmov %vm2388_vm15 }
 0x17a   :  { %v796_v41 = vadd.f32 %v1670_v22, %v756_v32  ;;  %v2069_v34 = vadd.f32 %v1033_v53, %v997_v16  ;;  %v520_v15 = vadd.f32 %v514_v40, %v467_v39  ;;  %vm765_vm2 = vcmp.ge.s32.totalorder %v1672_v23, 10 }
 0x17b   :  { %v644_v56 = vsel %vm2382_vm1, %v2396_v57, %v638_v28  ;;  %v753_v55 = vmul.f32 %v1638_v8, %v743_v52  ;;  %v798_v6 = vadd.f32 %v1670_v22, %v758_v10  ;;  %v321_v43 = vrot.slane %v1812_v31, 7 }
 0x17c   :  { %v673_v37 = vmul.f32 %v1635_v7, %v644_v56  ;;  %v1034_v11 = vmul.f32 %v1740_v5, %v644_v56  ;;  %vm805_vm6 = vcmp.ge.s32.totalorder %v1672_v23, 11  ;;  %v836_v38 = vadd.f32 %v1675_v25, %v796_v41 }
 0x17d   :  { %v573_v48 = vadd.f32 %v567_v30, %v520_v15  ;;  %v374_v53 = vrot.slane %v1812_v31, 6  ;;  %v427_v3 = vrot.slane %v1812_v31, 5  ;;  %vm580_vm13 = vcmp.ge.s32.totalorder %v1694_v33, 6 }
 0x17e   :  { %v838_v49 = vadd.f32 %v1675_v25, %v798_v6  ;;  %v2397_v51 = vrot.slane %v1773_v36, 7  ;;  %v480_v35 = vrot.slane %v1812_v31, 4  ;;  %v2351_v30 = vrot.slane %v1812_v31, 3  ;;  %v2407_v36 = vld [vmem:[#allocation22_spill] sm:$0xff] }
 0x17f   :  { %vm633_vm15 = vcmp.ge.s32.totalorder %v1694_v33, 7  ;;  %v876_v58 = vadd.f32 %v1678_v26, %v836_v38  ;;  %v626_v32 = vadd.f32 %v620_v29, %v573_v48  ;;  %v2104_v39 = vsel %vm2390_vm0, %v373_v1, %v374_v53 }
 0x180   :  { %v2089_v40 = vsel %vm2398_vm14, %v2397_v51, %v321_v43  ;;  %vm845_vm7 = vcmp.ge.s32.totalorder %v1672_v23, 12  ;;  %vm885_vm1 = vcmp.ge.s32.totalorder %v1672_v23, 13  ;;  %v878_v57 = vadd.f32 %v1678_v26, %v838_v49 }
 0x181   :  { %v346_v16 = vsel %vm315_vm8, %v2089_v40, 0.0  ;;  %v399_v56 = vsel %vm368_vm9, %v2104_v39, 0.0  ;;  %vm2399_vm8 = vcmp.lt.s32.totalorder %v1593_v46, 3  ;;  %vm925_vm14 = vcmp.ge.s32.totalorder %v1672_v23, 14 }
 0x182   :  { %v356_v29 = vmul.f32 %v1616_v61, %v346_v16  ;;  %v2119_v1 = vsel %vm2399_vm8, %v426_v54, %v427_v3  ;;  %v916_v52 = vadd.f32 %v1681_v27, %v876_v58  ;;  %v679_v10 = vadd.f32 %v673_v37, %v626_v32  ;;  %v2400_v37 = vld [vmem:[#allocation17_spill] sm:$0xff] }
 0x183   :  { %v409_v41 = vmul.f32 %v1618_v62, %v399_v56  ;;  %v452_v15 = vsel %vm421_vm10, %v2119_v1, 0.0  ;;  %v918_v6 = vadd.f32 %v1681_v27, %v878_v57  ;;  %v2135_v54 = vsel %vm482_vm3, %v479_v50, %v480_v35  ;;  %v2401_v57 = vld [vmem:[#allocation18_spill] sm:$0xff] }
 0x184   :  { %v362_v38 = vadd.f32 %v356_v29, %v309_v42  ;;  %v462_v48 = vmul.f32 %v1620_v63, %v452_v15  ;;  %v956_v49 = vadd.f32 %v2400_v37, %v916_v52  ;;  %v719_v51 = vadd.f32 %v713_v47, %v679_v10 }
 0x185   :  { %v505_v58 = vsel %vm474_vm11, %v2135_v54, 0.0  ;;  %v2147_v42 = vsel %vm535_vm4, %v532_v17, %v2351_v30  ;;  %v958_v32 = vadd.f32 %v2400_v37, %v918_v6  ;;  %v586_v10 = vrot.slane %v1812_v31, 2  ;;  %v2402_v6 = vld [vmem:[#allocation20_spill] sm:$0xff] }
 0x186   :  { %v415_v16 = vadd.f32 %v409_v41, %v362_v38  ;;  %v515_v50 = vmul.f32 %v1622_v0, %v505_v58  ;;  %v558_v47 = vsel %vm527_vm12, %v2147_v42, 0.0  ;;  %v996_v29 = vadd.f32 %v2401_v57, %v956_v49  ;;  %v2403_v38 = vld [vmem:[#allocation19_spill] sm:$0xff] }
 0x187   :  { %v759_v56 = vadd.f32 %v753_v55, %v719_v51  ;;  %v568_v52 = vmul.f32 %v1629_v2, %v558_v47  ;;  %v998_v15 = vadd.f32 %v2401_v57, %v958_v32  ;;  %v639_v30 = vrot.slane %v1812_v31, 1  ;;  %v2404_v51 = vld [vmem:[#allocation21_spill] sm:$0xff] }
 0x188   :  { %v468_v17 = vadd.f32 %v462_v48, %v415_v16  ;;  %v783_v41 = vsel %vm765_vm2, %v2402_v6, 0.0  ;;  %v1038_v58 = vadd.f32 %v2403_v38, %v996_v29  ;;  %v2167_v55 = vsel %vm588_vm5, %v585_v44, %v586_v10  ;;  %vm2414_vm2 = vmmov %vm2390_vm0 }
 0x189   :  { %v793_v49 = vmul.f32 %v1640_v9, %v783_v41  ;;  %v823_v48 = vsel %vm805_vm6, %v2404_v51, 0.0  ;;  %v1040_v32 = vadd.f32 %v1034_v11, %v998_v15  ;;  %v611_v47 = vsel %vm580_vm13, %v2167_v55, 0.0  ;;  %vm2416_vm6 = vmmov %vm2399_vm8 }
 0x18a   :  { %v521_v16 = vadd.f32 %v515_v50, %v468_v17  ;;  %vm2405_vm9 = vcmp.lt.s32.totalorder %v1593_v46, 7  ;;  %1153 = vmatmul.mubr.f32.vlgmr.msra.gmra.mrb[0].mxu1 %v1038_v58  ;;  %v833_v41 = vmul.f32 %v1647_v12, %v823_v48  ;;  %vm965_vm10 = vcmp.ge.s32.totalorder %v1672_v23, 15  ;;  %v2408_v17 = vld [vmem:[#allocation23_spill] sm:$0xff]  ;;  %v2409_v58 = vld [vmem:[#allocation24_spill] sm:$0xff] }
 0x18b   :  { %v2180_v29 = vsel %vm2405_vm9, %v638_v28, %v639_v30  ;;  %v799_v6 = vadd.f32 %v793_v49, %v759_v56  ;;  %v2406_v11 = vmov 0.0   ;;  %v621_v15 = vmul.f32 %v1631_v4, %v611_v47 }
 0x18c   :  { %v664_v44 = vsel %vm633_vm15, %v2180_v29, 0.0  ;;  %1158 = vmatprep.mubr.f32.mxu1 %v2406_v11  ;;  %v574_v50 = vadd.f32 %v568_v52, %v521_v16  ;;  %v863_v28 = vsel %vm845_vm7, %v2407_v36, 0.0  ;;  %v903_v38 = vsel %vm885_vm1, %v2408_v17, 0.0 }
 0x18d   :  { %v839_v33 = vadd.f32 %v833_v41, %v799_v6  ;;  %v873_v56 = vmul.f32 %v1649_v13, %v863_v28  ;;  %v943_v49 = vsel %vm925_vm14, %v2409_v58, 0.0  ;;  %v674_v52 = vmul.f32 %v1635_v7, %v664_v44 }
 0x18e   :  { %v627_v51 = vadd.f32 %v621_v15, %v574_v50  ;;  %vm1005_vm11 = vcmp.lt.s32.totalorder %v1672_v23, 15  ;;  %v228_v48 = vadd.s32 40, %v1593_v46  ;;  %1159 = vmatmul.mubr.f32.gmra.mrb[2].mxu1 %v2069_v34  ;;  %v913_v47 = vmul.f32 %v1651_v14, %v903_v38  ;;  %v2410_v15 = vld [vmem:[#allocation25_spill] sm:$0xff] }
 0x18f   :  { %v879_v16 = vadd.f32 %v873_v56, %v839_v33  ;;  %v953_v6 = vmul.f32 %v1659_v18, %v943_v49  ;;  %v983_v41 = vsel %vm965_vm10, %v1877_v24, 0.0  ;;  %1164 = vmatprep.mubr.f32.mxu1 %v2406_v11  ;;  %v2411_v44 = vrot.slane %v2410_v15, 7 }
 0x190   :  { %v680_v50 = vadd.f32 %v674_v52, %v627_v51  ;;  %vm2412_vm12 = vcmp.lt.s32.totalorder %v1593_v46, 1  ;;  %v2413_v34 = vrot.slane %v2410_v15, 6  ;;  %v2415_v23 = vrot.slane %v2410_v15, 5 }
 0x191   :  { %v324_v36 = vsel %vm2412_vm12, %v321_v43, %v2411_v44  ;;  %v919_v17 = vadd.f32 %v913_v47, %v879_v16  ;;  %v1023_v38 = vsel %vm1005_vm11, %v2180_v29, 0.0  ;;  %v310_v43 = vmul.f32 %v2410_v15, %v1610_v59 }
 0x192   :  { %v377_v28 = vsel %vm2414_vm2, %v374_v53, %v2413_v34  ;;  %v430_v24 = vsel %vm2416_vm6, %v427_v3, %v2415_v23  ;;  %v357_v33 = vmul.f32 %v1616_v61, %v324_v36  ;;  %v720_v56 = vadd.f32 %v1664_v20, %v680_v50  ;;  %1165 = vmatmul.mubr.f32.gmra.mrb[4].mxu1 %v1040_v32 }
 0x193   :  { %v2417_v58 = vrot.slane %v2410_v15, 4  ;;  %v2418_v49 = vrot.slane %v2410_v15, 3  ;;  %v2419_v3 = vrot.slane %v1812_v31, 3  ;;  %v2420_v59 = vrot.slane %v2410_v15, 2  ;;  %1170 = vmatprep.mubr.f32.mxu1 %v2406_v11 }
 0x194   :  { %v959_v20 = vadd.f32 %v953_v6, %v919_v17  ;;  %v993_v52 = vmul.f32 %v1661_v19, %v983_v41  ;;  %v363_v16 = vadd.f32 %v357_v33, %v310_v43  ;;  %v410_v47 = vmul.f32 %v1618_v62, %v377_v28 }
 0x195   :  { %v483_v53 = vsel %vm482_vm3, %v480_v35, %v2417_v58  ;;  %v536_v51 = vsel %vm535_vm4, %v2419_v3, %v2418_v49  ;;  %v589_v61 = vsel %vm588_vm5, %v586_v10, %v2420_v59  ;;  %v2421_v35 = vrot.slane %v2410_v15, 1  ;;  %vm2422_vm3 = vmmov %vm2405_vm9 }
 0x196   :  { %v999_v44 = vadd.f32 %v993_v52, %v959_v20  ;;  %v1035_v36 = vmul.f32 %v1740_v5, %v1023_v38  ;;  %v416_v34 = vadd.f32 %v410_v47, %v363_v16  ;;  %v463_v10 = vmul.f32 %v1620_v63, %v430_v24 }
 0x197   :  { %v642_v50 = vsel %vm2422_vm3, %v639_v30, %v2421_v35  ;;  %v760_v32 = vadd.f32 %v1667_v21, %v720_v56  ;;  %v268_v41 = vand.u32 15, %v228_v48  ;;  %v516_v62 = vmul.f32 %v1622_v0, %v483_v53 }
 0x198   :  { %v1041_v6 = vadd.f32 %v1035_v36, %v999_v44  ;;  %v469_v23 = vadd.f32 %v463_v10, %v416_v34  ;;  %v569_v46 = vmul.f32 %v1629_v2, %v536_v51  ;;  %v622_v63 = vmul.f32 %v1631_v4, %v589_v61 }
 0x199   :  { %v800_v28 = vadd.f32 %v1670_v22, %v760_v32  ;;  %vm727_vm4 = vcmp.ge.s32.totalorder %v268_v41, 9  ;;  %v675_v24 = vmul.f32 %v1635_v7, %v642_v50  ;;  %vm767_vm5 = vcmp.ge.s32.totalorder %v268_v41, 10 }
 0x19a   :  { %1171 = vmatmul.mubr.f32.gmra.mrb[6].mxu1 %v1041_v6  ;;  %v522_v15 = vadd.f32 %v516_v62, %v469_v23  ;;  %v745_v0 = vsel %vm727_vm4, %v2089_v40, 0.0  ;;  %v715_v2 = vmul.f32 %v1812_v31, %v1613_v60  ;;  %vm807_vm13 = vcmp.ge.s32.totalorder %v268_v41, 11 }
 0x19b   :  { %1176 = vmatprep.mubr.f32.mxu1 %v2406_v11  ;;  %v840_v30 = vadd.f32 %v1675_v25, %v800_v28  ;;  %v785_v4 = vsel %vm767_vm5, %v2104_v39, 0.0  ;;  %vm847_vm15 = vcmp.ge.s32.totalorder %v268_v41, 12  ;;  %v1036_v33 = vmul.f32 %v1740_v5, %v642_v50 }
 0x19c   :  { %v575_v17 = vadd.f32 %v569_v46, %v522_v15  ;;  %v825_v40 = vsel %vm807_vm13, %v2119_v1, 0.0  ;;  %v795_v56 = vmul.f32 %v1640_v9, %v785_v4  ;;  %vm887_vm0 = vcmp.ge.s32.totalorder %v268_v41, 13 }
 0x19d   :  { %v880_v21 = vadd.f32 %v1678_v26, %v840_v30  ;;  %v755_v26 = vmul.f32 %v1638_v8, %v745_v0  ;;  %v865_v31 = vsel %vm847_vm15, %v2135_v54, 0.0  ;;  %v835_v39 = vmul.f32 %v1647_v12, %v825_v40 }
 0x19e   :  { %v628_v48 = vadd.f32 %v622_v63, %v575_v17  ;;  %vm927_vm7 = vcmp.ge.s32.totalorder %v268_v41, 14  ;;  %v905_v8 = vsel %vm887_vm0, %v2147_v42, 0.0  ;;  %v875_v58 = vmul.f32 %v1649_v13, %v865_v31 }
 0x19f   :  { %v920_v22 = vadd.f32 %v1681_v27, %v880_v21  ;;  %vm967_vm1 = vcmp.ge.s32.totalorder %v268_v41, 15  ;;  %v945_v1 = vsel %vm927_vm7, %v2167_v55, 0.0  ;;  %v915_v53 = vmul.f32 %v1651_v14, %v905_v8  ;;  %v1076_v14 = vld [vmem:[%s2314_s5] sm:$0x3]  ;;  %v2423_v55 = vld [vmem:[#allocation15_spill] sm:$0xff]  ;;  %s1485_s5 = smov [#allocation10]  }
 0x1a0   :  { %v681_v38 = vadd.f32 %v675_v24, %v628_v48  ;;  %vm1007_vm8 = vcmp.lt.s32.totalorder %v268_v41, 15  ;;  %v985_v54 = vsel %vm967_vm1, %v2180_v29, 0.0  ;;  %v955_v12 = vmul.f32 %v1659_v18, %v945_v1  ;;  %v2424_v29 = vld [vmem:[#allocation16_spill] sm:$0xff]  ;;  %s1219_s26 = sshll.u32 %s1485_s5, 4  ;;  %s1220_s26 = int_to_ptr.vmem [resolvable:$true] %s1219_s26 }
 0x1a1   :  { %v960_v25 = vadd.f32 %v2400_v37, %v920_v22  ;;  %v1025_v3 = vsel %vm1007_vm8, %v1950_v45, 0.0  ;;  %v1081_v61 = vrot.slane %v1076_v14, %v2423_v55  ;;  %v1085_v20 = vrot.slane %v1076_v14, %v2424_v29  ;;  %s1446_s27 = scalar_lea.vmem %s1220_s26, 1536  ;;  %p1451_p5 = scmp.lt.s32.totalorder %s1220_s26, %s1220_s26 }
 0x1a2   :  { %v721_v43 = vadd.f32 %v715_v2, %v681_v38  ;;  %v1037_v13 = vmul.f32 %v1740_v5, %v1025_v3  ;;  %p1447_p4 = scmp.ne.s32.totalorder %s1220_s26, %s1446_s27  ;;  %p1452_p6 = scmp.lt.s32.totalorder %s1446_s27, %s1446_s27 }
 0x1a3   :  { %v1000_v7 = vadd.f32 %v2401_v57, %v960_v25 }
 0x1a4   :  { %v761_v27 = vadd.f32 %v755_v26, %v721_v43  ;;  %p1453_p7 = por %p1452_p6, %p1451_p5 }
 0x1a5   :  { %v1042_v60 = vadd.f32 %v1036_v33, %v1000_v7 }
 0x1a6   :  { %v801_v37 = vadd.f32 %v795_v56, %v761_v27  ;;  %p1454_p8 = pnand %p1453_p7, %p1447_p4 }
 0x1a7   :  { %1177 = vmatmul.mubr.f32.gmra.mrb[8].mxu1 %v1042_v60 }
 0x1a8   :  { %1182 = vmatprep.mubr.f32.mxu1 %v2406_v11  ;;  %v841_v57 = vadd.f32 %v835_v39, %v801_v37  ;;  %v995_v11 = vmul.f32 %v1661_v19, %v985_v54 }
 0x1aa   :  { %v881_v9 = vadd.f32 %v875_v58, %v841_v57 }
 0x1ac   :  { %v921_v49 = vadd.f32 %v915_v53, %v881_v9 }
 0x1ae   :  { %v961_v42 = vadd.f32 %v955_v12, %v921_v49 }
 0x1b0   :  { %v1001_v51 = vadd.f32 %v995_v11, %v961_v42 }
 0x1b2   :  { %v1043_v59 = vadd.f32 %v1037_v13, %v1001_v51 }
 0x1b4   :  { %1183 = vmatmul.mubr.f32.gmra.mrb[10].mxu1 %v1043_v59 }
 0x25d   :  { %v1154_v52 = vpop.f32.mrb[0].mxu1 }
 0x25e   :  { %v1155_v18 = vadd.f32 %v1154_v52, %v1081_v61  ;;  %v1156_v16 = vpop.f32.mrb[1].mxu1 }
 0x25f   :  { %v1157_v45 = vadd.f32 %v1156_v16, %v1085_v20 }
 0x260   :  { %v1189_v47 = vmax.f32 %v1155_v18, 0.0 }
 0x261   :  { %v1190_v35 = vmax.f32 %v1157_v45, 0.0  ;;  %v1160_v19 = vpop.f32.mrb[2].mxu1 }
 0x262   :  { %1201 = vst [vmem:[#allocation10] sm:$0xff] %v1189_v47  ;;  %v1161_v50 = vadd.f32 %v1160_v19, %v1081_v61  ;;  %v1162_v5 = vpop.f32.mrb[3].mxu1 }
 0x263   :  { %1208 = vst [vmem:[#allocation10 + $0x30] sm:$0xff] %v1190_v35  ;;  %v1163_v44 = vadd.f32 %v1162_v5, %v1085_v20 }
 0x264   :  { %v1191_v36 = vmax.f32 %v1161_v50, 0.0 }
 0x265   :  { %v1192_v34 = vmax.f32 %v1163_v44, 0.0  ;;  %v1166_v10 = vpop.f32.mrb[4].mxu1 }
 0x266   :  { %1202 = vst [vmem:[#allocation10 + $0x8] sm:$0xff] %v1191_v36  ;;  %v1167_v32 = vadd.f32 %v1166_v10, %v1081_v61  ;;  %v1168_v6 = vpop.f32.mrb[5].mxu1 }
 0x267   :  { %1209 = vst [vmem:[#allocation10 + $0x38] sm:$0xff] %v1192_v34  ;;  %v1169_v41 = vadd.f32 %v1168_v6, %v1085_v20 }
 0x268   :  { %v1193_v23 = vmax.f32 %v1167_v32, 0.0 }
 0x269   :  { %v1194_v62 = vmax.f32 %v1169_v41, 0.0 }
 0x26a   :  { %1203 = vst [vmem:[#allocation10 + $0x10] sm:$0xff] %v1193_v23 }
 0x26b   :  { %1210 = vst [vmem:[#allocation10 + $0x40] sm:$0xff] %v1194_v62 }
 0x26d   :  { %v1172_v28 = vpop.f32.mrb[6].mxu1 }
 0x26e   :  { %v1173_v15 = vadd.f32 %v1172_v28, %v1081_v61  ;;  %v1174_v46 = vpop.f32.mrb[7].mxu1 }
 0x26f   :  { %v1175_v30 = vadd.f32 %v1174_v46, %v1085_v20 }
 0x270   :  { %v1195_v17 = vmax.f32 %v1173_v15, 0.0 }
 0x271   :  { %v1196_v63 = vmax.f32 %v1175_v30, 0.0 }
 0x272   :  { %1204 = vst [vmem:[#allocation10 + $0x18] sm:$0xff] %v1195_v17 }
 0x273   :  { %1211 = vst [vmem:[#allocation10 + $0x48] sm:$0xff] %v1196_v63 }
 0x27a   :  { %v1178_v21 = vpop.f32.mrb[8].mxu1 }
 0x27b   :  { %v1179_v48 = vadd.f32 %v1178_v21, %v1081_v61  ;;  %v1180_v24 = vpop.f32.mrb[9].mxu1 }
 0x27c   :  { %v1181_v0 = vadd.f32 %v1180_v24, %v1085_v20 }
 0x27d   :  { %v1197_v22 = vmax.f32 %v1179_v48, 0.0 }
 0x27e   :  { %v1198_v38 = vmax.f32 %v1181_v0, 0.0 }
 0x27f   :  { %1205 = vst [vmem:[#allocation10 + $0x20] sm:$0xff] %v1197_v22 }
 0x280   :  { %1212 = vst [vmem:[#allocation10 + $0x50] sm:$0xff] %v1198_v38 }
 0x287   :  { %v1184_v2 = vpop.f32.mrb[10].mxu1 }
 0x288   :  { %v1185_v25 = vadd.f32 %v1184_v2, %v1081_v61  ;;  %v1186_v4 = vpop.f32.mrb[11].mxu1 }
 0x289   :  { %v1187_v43 = vadd.f32 %v1186_v4, %v1085_v20 }
 0x28a   :  { %v1199_v26 = vmax.f32 %v1185_v25, 0.0 }
 0x28b   :  { %v1200_v7 = vmax.f32 %v1187_v43, 0.0 }
 0x28c   :  { %1206 = vst [vmem:[#allocation10 + $0x28] sm:$0xff] %v1199_v26 }
 0x28d   :  { %1213 = vst [vmem:[#allocation10 + $0x58] sm:$0xff] %v1200_v7 }
 0x28e   :  { %1457 = shalt.err (!%p1454_p8)
}
 0x28f   :  { %s1458_s30 = scalar_lea.hbm %s2315_s6, 1536 }
 0x290   :  { %p1459_p9 = scmp.ne.s32.totalorder %s2315_s6, %s1458_s30  ;;  %p1462_p10 = scmp.lt.u32.totalorder %s1458_s30, %s2315_s6 }
 0x292   :  { %p1464_p11 = pnand %p1462_p10, %p1459_p9 }
 0x294   :  { %1467 = shalt.err (!%p1464_p11)
}
 0x295   :  { %1225 = dma.vmem_to_hbm [thread:$0]  %s1220_s26, 1536, %s2315_s6, [#allocation4], %s1478_s9, %s1478_s9, %s1479_s10  }
 0x296   :  { %1474 = dma.done.wait [#allocation4], 1536  }
 0x297   :  { %1475 = vsyncadd [#allocation4], 4294965760 }
 0x298   :  { %1229 = vsyncpa [#allocation3], 1 }
 0x299   :  { %1230 = vsyncpa [#allocation6], 1 }
 0x29a   :  { %1231 = vsyncpa [#allocation9], 1 }
 0x29b   :  { %1232 = vsyncpa [#allocation4], 1 }

</bundles_post_ra>
